<compile_context>
chip_gen: v5e
topology: v5e:2x2
jax: 0.10.0
libtpu: 0.0.40
codegen_flags: <defaults>
</compile_context>

<pallas_src>
import jax
import jax.numpy as jnp
from jax.experimental import pallas as pl
from jax.experimental.pallas import tpu as pltpu

# ----------------------------- model hyper-params (small synthetic sizes) ---
BATCH = 2
NUM_CHANNEL = 4        # EEG channels
SIGNAL_LEN = 16        # must be divisible by 4
DEPTH = 4
FIRST_FILTER = 8       # first_filter_size
NUM_CLASSES = 4

F0 = FIRST_FILTER                  # filter_size[0]
F1 = FIRST_FILTER * DEPTH          # filter_size[1]  (4 towers concatenated)
K1 = 16                            # first temporal conv kernel (1, 16)
K_T1 = 7                           # tower-1 separable kernel
K_T2 = 9                           # tower-2 separable kernel
K_C2 = 5                           # conv2 separable kernel
T0 = SIGNAL_LEN
T1 = SIGNAL_LEN // 2
T2 = SIGNAL_LEN // 4
GRP = F1 // NUM_CLASSES            # AvgPool3d channel-group size

PAD_COLS = 32                      # lane padding of the packed weight buffers


# ----------------------------- parameter init ------------------------------
def init_params(key):
    """Deterministic synthetic parameters.  BN is folded to (scale, shift)."""
    p = {}

    def add_w(name, shape, scale=0.3):
        nonlocal key
        key, sub = jax.random.split(key)
        p[name] = (scale * jax.random.normal(sub, shape)).astype(jnp.float32)

    def add_bn(prefix, c):
        nonlocal key
        key, k1, k2, k3, k4 = jax.random.split(key, 5)
        gamma = 1.0 + 0.1 * jax.random.normal(k1, (c, 1))
        beta = 0.1 * jax.random.normal(k2, (c, 1))
        mean = 0.1 * jax.random.normal(k3, (c, 1))
        var = 1.0 + 0.1 * jnp.abs(jax.random.normal(k4, (c, 1)))
        s = gamma / jnp.sqrt(var + 1e-5)
        p[prefix + "_s"] = s.astype(jnp.float32)
        p[prefix + "_b"] = (beta - mean * s).astype(jnp.float32)

    # conv1 block
    add_w("w_c1", (F0, K1))
    add_w("b_c1", (F0, 1))
    add_bn("bn1", F0)
    add_w("w_dw", (F0, NUM_CHANNEL))
    add_w("b_dw", (F0, 1))
    add_bn("bn2", F0)

    # inception towers 1 (k=7) and 2 (k=9)
    for t, k in (("t1", K_T1), ("t2", K_T2)):
        add_w(f"{t}_pw_w", (F0, F0)); add_w(f"{t}_pw_b", (F0, 1))
        add_w(f"{t}_s1_dw_w", (F0, k)); add_w(f"{t}_s1_dw_b", (F0, 1))
        add_w(f"{t}_s1_pw_w", (F0, F0)); add_w(f"{t}_s1_pw_b", (F0, 1))
        add_bn(f"{t}_bn", F0)
        add_w(f"{t}_s2_dw_w", (F0, k)); add_w(f"{t}_s2_dw_b", (F0, 1))
        add_w(f"{t}_s2_pw_w", (F0, F0)); add_w(f"{t}_s2_pw_b", (F0, 1))

    # towers 3 and 4 (1x1 convs)
    add_w("t3_pw_w", (F0, F0)); add_w("t3_pw_b", (F0, 1))
    add_w("t4_pw_w", (F0, F0)); add_w("t4_pw_b", (F0, 1))

    # conv2 block
    add_bn("c2_bn1", F1)
    add_w("c2_s_dw_w", (F1, K_C2)); add_w("c2_s_dw_b", (F1, 1))
    add_w("c2_s_pw_w", (F1, F1)); add_w("c2_s_pw_b", (F1, 1))
    add_bn("c2_bn2", F1)
    return p


# ----------------------------- host-side matrices ---------------------------
def _seg(b, t):
    idx = jnp.arange(b * t)
    return idx // t, idx % t


def shift_mat(b, t, off):
    """M[(b,t'), (b,t)] = 1 iff t' == t + off (same sample; zero boundary)."""
    rb, rt = _seg(b, t)
    cb, ct = _seg(b, t)
    m = (rb[:, None] == cb[None, :]) & (rt[:, None] == ct[None, :] + off)
    return m.astype(jnp.float32)


def pool2_mat(b, t_in):
    """AvgPool2d((1,2)) as a right-multiply matrix, block-diag per sample."""
    rb, rt = _seg(b, t_in)
    cb, ct = _seg(b, t_in // 2)
    m = (rb[:, None] == cb[None, :]) & (rt[:, None] // 2 == ct[None, :])
    return 0.5 * m.astype(jnp.float32)


def stride2_mat(b, t_in):
    """1x1 conv with stride (1,2) 'SAME': select even time positions."""
    rb, rt = _seg(b, t_in)
    cb, ct = _seg(b, t_in // 2)
    m = (rb[:, None] == cb[None, :]) & (rt[:, None] == 2 * ct[None, :])
    return m.astype(jnp.float32)


def time_avg_mat(b, t):
    """(b*t, b) per-sample time average (AvgPool3d time part, 1/T2 folded)."""
    rb, _ = _seg(b, t)
    return jnp.where(rb[:, None] == jnp.arange(b)[None, :], 1.0 / t,
                     0.0).astype(jnp.float32)


def group_avg_mat():
    """(NUM_CLASSES, F1) channel-group average (AvgPool3d channel part)."""
    r = jnp.arange(NUM_CLASSES)[:, None]
    c = jnp.arange(F1)[None, :]
    return jnp.where(c // GRP == r, 1.0 / GRP, 0.0).astype(jnp.float32)


# ----------------------------- parameter packing ----------------------------
def _pad2(a, rows, cols):
    a = jnp.asarray(a, jnp.float32)
    out = jnp.zeros((rows, cols), jnp.float32)
    return out.at[:a.shape[0], :a.shape[1]].set(a)


def pack_left(entries, ncols):
    """Left-operand (weight) matrices -> one (R, ncols) buffer + offsets."""
    meta, blocks, r = {}, [], 0
    for name, a in entries:
        a = jnp.asarray(a, jnp.float32)
        nr, nc = a.shape
        nr_pad = -(-nr // 8) * 8
        blocks.append(_pad2(a, nr_pad, ncols))
        meta[name] = (r, nr, nc)
        r += nr_pad
    return jnp.concatenate(blocks, axis=0), meta


def pack_right(entries, ncols):
    """Right-operand (shift/pool) matrices, optionally stacked along dim 0."""
    meta, blocks, r = {}, [], 0
    for name, a in entries:
        a = jnp.asarray(a, jnp.float32)
        if a.ndim == 2:
            a = a[None]
        s, nr, nc = a.shape
        blocks.append(_pad2(a.reshape(s * nr, nc), s * nr, ncols))
        meta[name] = (r, nr, nc, s)
        r += s * nr
    packed = jnp.concatenate(blocks, axis=0)
    pad = (-packed.shape[0]) % 8
    if pad:
        packed = jnp.concatenate(
            [packed, jnp.zeros((pad, ncols), jnp.float32)], axis=0)
    return packed, meta


def pack_vec(entries, nrows):
    """Bias / affine column vectors -> one (nrows, n_entries) buffer."""
    meta, cols = {}, []
    for j, (name, v) in enumerate(entries):
        v = jnp.asarray(v, jnp.float32).reshape(-1)
        cols.append(jnp.zeros((nrows,), jnp.float32).at[:v.shape[0]].set(v))
        meta[name] = (j, v.shape[0])
    return jnp.stack(cols, axis=1), meta


# ----------------------------- host-side folding ----------------------------
def fold_params(p, b_blk):
    """Fold BN / biases into matmul-ready operators, pack into 3 buffers."""
    # conv1 + BN1 + depthwise(C_eeg,1) + BN2 folded to one (K1*F0, NC) operator
    w1_eff = p["w_c1"] * p["bn1_s"]                               # (F0, K1)
    b1_eff = p["b_c1"] * p["bn1_s"] + p["bn1_b"]                  # (F0, 1)
    wc = (p["bn2_s"][:, :, None] * p["w_dw"][:, :, None]) * w1_eff[:, None, :]
    wflat_c1 = jnp.transpose(wc, (2, 0, 1)).reshape(K1 * F0, NUM_CHANNEL)
    bias_c1 = (p["bn2_s"] *
               (jnp.sum(p["w_dw"], axis=1, keepdims=True) * b1_eff + p["b_dw"])
               + p["bn2_b"])

    def fold_sep(pw_w, pw_b, dw_w, dw_b, scale=None, shift=None):
        # SeparableConv (+ optional following BN affine) as
        #   out = sum_k A_k @ x @ Shift_{k-pad} + bias,   A_k = scale*pw ∘ dw[:,k]
        fo, fi = pw_w.shape
        k = dw_w.shape[1]
        if scale is None:
            scale = jnp.ones((fo, 1), jnp.float32)
        if shift is None:
            shift = jnp.zeros((fo, 1), jnp.float32)
        a = (scale[None, :, :] * pw_w[None, :, :]) * jnp.transpose(dw_w)[:, None, :]
        aflat = a.reshape(k * fo, fi)
        bias = scale * (pw_w @ dw_b + pw_b) + shift
        return aflat, bias

    t1_a, t1_a_b = fold_sep(p["t1_s1_pw_w"], p["t1_s1_pw_b"],
                            p["t1_s1_dw_w"], p["t1_s1_dw_b"],
                            p["t1_bn_s"], p["t1_bn_b"])
    t1_b, t1_b_b = fold_sep(p["t1_s2_pw_w"], p["t1_s2_pw_b"],
                            p["t1_s2_dw_w"], p["t1_s2_dw_b"])
    t2_a, t2_a_b = fold_sep(p["t2_s1_pw_w"], p["t2_s1_pw_b"],
                            p["t2_s1_dw_w"], p["t2_s1_dw_b"],
                            p["t2_bn_s"], p["t2_bn_b"])
    t2_b, t2_b_b = fold_sep(p["t2_s2_pw_w"], p["t2_s2_pw_b"],
                            p["t2_s2_dw_w"], p["t2_s2_dw_b"])
    c2_sep, c2_sep_b = fold_sep(p["c2_s_pw_w"], p["c2_s_pw_b"],
                                p["c2_s_dw_w"], p["c2_s_dw_b"])

    wpack, wmeta = pack_left([
        ("c1_w", wflat_c1),
        ("t1_pw0", p["t1_pw_w"]), ("t2_pw0", p["t2_pw_w"]),
        ("t1_a", t1_a), ("t1_b", t1_b),
        ("t2_a", t2_a), ("t2_b", t2_b),
        ("pw3", p["t3_pw_w"]), ("pw4", p["t4_pw_w"]),
        ("c2_sep", c2_sep), ("gmat", group_avg_mat()),
    ], PAD_COLS)

    vpack, vmeta = pack_vec([
        ("c1_b", bias_c1),
        ("t1_pw0_b", p["t1_pw_b"]), ("t2_pw0_b", p["t2_pw_b"]),
        ("t1_a_b", t1_a_b), ("t1_b_b", t1_b_b),
        ("t2_a_b", t2_a_b), ("t2_b_b", t2_b_b),
        ("b3", p["t3_pw_b"]), ("b4", p["t4_pw_b"]),
        ("c2bn1_s", p["c2_bn1_s"]), ("c2bn1_b", p["c2_bn1_b"]),
        ("c2sep_b", c2_sep_b),
        ("c2bn2_s", p["c2_bn2_s"]), ("c2bn2_b", p["c2_bn2_b"]),
    ], F1)

    # SAME-padded shift / pool / selection matrices, block-diag per sample.
    s0 = jnp.stack([shift_mat(b_blk, T0, k - 7) for k in range(K1)])   # off -7..8
    s1 = jnp.stack([shift_mat(b_blk, T1, o) for o in range(-4, 5)])    # off -4..4
    p1 = pool2_mat(b_blk, T1)
    sp1 = jnp.einsum("kab,bc->kac", s1, p1)      # shift then AvgPool(1,2) fused
    s2 = jnp.stack([shift_mat(b_blk, T2, o) for o in range(-2, 3)])    # off -2..2
    mpack, mmeta = pack_right([
        ("s0", s0), ("s1", s1), ("sp1", sp1), ("s2", s2),
        ("p0", pool2_mat(b_blk, T0)), ("p1", p1),
        ("sub1", stride2_mat(b_blk, T1)), ("tavg", time_avg_mat(b_blk, T2)),
    ], PAD_COLS)

    return (wpack, wmeta), (vpack, vmeta), (mpack, mmeta)


# ----------------------------- kernel ---------------------------------------
def make_kernel(wmeta, vmeta, mmeta):
    def kernel(x_ref, wp_ref, vp_ref, mp_ref, out_ref, zc_ref):
        def W(name):                                  # left-operand weights
            r, nr, nc = wmeta[name]
            return wp_ref[r:r + nr, 0:nc]

        def V(name):                                  # (C,1) bias/affine vecs
            j, n = vmeta[name]
            return vp_ref[0:n, j:j + 1]

        def M(name, k=0):                             # right-operand matrices
            r, sub, nc, _ = mmeta[name]
            r = r + k * sub
            return mp_ref[r:r + sub, 0:nc]

        def dot(a, b):
            return jnp.dot(a, b, preferred_element_type=jnp.float32)

        def elu(v):
            return jnp.where(v > 0, v, jnp.exp(v) - 1.0)

        def conv_accum(w_name, act, s_name, ksize, cout, center):
            # folded conv:  sum_k  Wflat[k*cout:(k+1)*cout] @ act @ Shift_{k-pad}
            g = dot(W(w_name), act)                   # single stacked matmul
            pad_l = (ksize - 1) // 2
            acc = None
            for k in range(ksize):
                term = dot(g[k * cout:(k + 1) * cout, :],
                           M(s_name, center + k - pad_l))
                acc = term if acc is None else acc + term
            return acc

        x = x_ref[...]                                # (NC, B*T0), lanes=(b,t)

        # ---- conv1 (+BN1 +depthwise +BN2 folded) -> ELU -> AvgPool(1,2) ----
        h2 = elu(conv_accum("c1_w", x, "s0", K1, F0, center=7) + V("c1_b"))
        z = dot(h2, M("p0"))                          # (F0, B*T1)

        # ---- inception towers: write straight into the zc scratch ----------
        def tower(pw0, pw0_b, a_w, a_b, b_w, b_b, ksize):
            y0 = dot(W(pw0), z) + V(pw0_b)                              # 1x1
            u = elu(conv_accum(a_w, y0, "s1", ksize, F0, center=4) + V(a_b))
            return conv_accum(b_w, u, "sp1", ksize, F0, center=4) + V(b_b)

        zc_ref[0 * F0:1 * F0, :] = tower("t1_pw0", "t1_pw0_b", "t1_a", "t1_a_b",
                                         "t1_b", "t1_b_b", K_T1)
        zc_ref[1 * F0:2 * F0, :] = tower("t2_pw0", "t2_pw0_b", "t2_a", "t2_a_b",
                                         "t2_b", "t2_b_b", K_T2)
        zc_ref[2 * F0:3 * F0, :] = dot(W("pw3"), dot(z, M("p1"))) + V("b3")
        zc_ref[3 * F0:4 * F0, :] = dot(W("pw4"), dot(z, M("sub1"))) + V("b4")

        # ---- conv2: BN -> ELU -> SepConv(1,5) -> BN -> ELU -> global avg ---
        zc = zc_ref[...]                              # (F1, B*T2)
        a2 = elu(zc * V("c2bn1_s") + V("c2bn1_b"))
        w2 = conv_accum("c2_sep", a2, "s2", K_C2, F1, center=2) + V("c2sep_b")
        w2 = elu(w2 * V("c2bn2_s") + V("c2bn2_b"))
        # AvgPool3d: 1/T2 folded into tavg, 1/GRP folded into gmat.
        out_ref[...] = dot(W("gmat"), dot(w2, M("tavg")))   # (NCLS, B) lane-dense

    return kernel


# ----------------------------- wrapper ---------------------------------------
def mieegnet_forward(x, params):
    n = x.shape[0]
    b_blk = n          # whole (small) batch packed onto lanes in one grid step
    # TODO(synk): for large N use b_blk >= 8 with several "parallel" grid
    # blocks (keeps both v7x TensorCores busy) and bf16 matmul operands.
    (wpack, wmeta), (vpack, vmeta), (mpack, mmeta) = fold_params(params, b_blk)

    # host-side layout plumbing: (N, NC, T) -> (NC, N*T) with lanes = (b, t)
    xw = jnp.transpose(x, (1, 0, 2)).reshape(NUM_CHANNEL, n * SIGNAL_LEN)
    kernel = make_kernel(wmeta, vmeta, mmeta)

    out = pl.pallas_call(
        kernel,
        out_shape=jax.ShapeDtypeStruct((NUM_CLASSES, n), jnp.float32),
        grid_spec=pltpu.PrefetchScalarGridSpec(
            num_scalar_prefetch=0,
            grid=(n // b_blk,),
            in_specs=[
                pl.BlockSpec((NUM_CHANNEL, b_blk * SIGNAL_LEN), lambda i: (0, i)),
                pl.BlockSpec(wpack.shape, lambda i: (0, 0)),
                pl.BlockSpec(vpack.shape, lambda i: (0, 0)),
                pl.BlockSpec(mpack.shape, lambda i: (0, 0)),
            ],
            out_specs=pl.BlockSpec((NUM_CLASSES, b_blk), lambda i: (0, i)),
            scratch_shapes=[pltpu.VMEM((F1, b_blk * T2), jnp.float32)],
        ),
        compiler_params=pltpu.CompilerParams(
            dimension_semantics=("parallel",)),
    )(xw, wpack, vpack, mpack)
    return out.T                                      # (N, NUM_CLASSES)


# ----------------------------- pure-JAX reference (original op order) -------
def reference_forward(x, p):
    def elu(v): return jnp.where(v > 0, v, jnp.exp(v) - 1.0)

    def same_pad(h, k):
        pad_l = (k - 1) // 2
        return jnp.pad(h, ((0, 0), (pad_l, k - 1 - pad_l)))

    def dw_conv(h, w, b):
        c, t = h.shape
        k = w.shape[1]
        hp = same_pad(h, k)
        acc = jnp.zeros((c, t), jnp.float32)
        for kk in range(k):
            acc = acc + w[:, kk:kk + 1] * hp[:, kk:kk + t]
        return acc + b

    def pw(h, w, b): return w @ h + b

    def sep(h, pre):
        return pw(dw_conv(h, p[pre + "_dw_w"], p[pre + "_dw_b"]),
                  p[pre + "_pw_w"], p[pre + "_pw_b"])

    def pool2(h):
        c, t = h.shape
        return h.reshape(c, t // 2, 2).mean(axis=2)

    gm = (jnp.arange(F1)[None, :] // GRP ==
          jnp.arange(NUM_CLASSES)[:, None]).astype(jnp.float32)

    outs = []
    for i in range(x.shape[0]):
        xi = x[i]
        xp = same_pad(xi, K1)
        h = jnp.zeros((F0, SIGNAL_LEN), jnp.float32)
        for c in range(NUM_CHANNEL):
            acc = jnp.zeros((F0, SIGNAL_LEN), jnp.float32)
            for k in range(K1):
                acc = acc + p["w_c1"][:, k:k + 1] * xp[c:c + 1, k:k + SIGNAL_LEN]
            acc = (acc + p["b_c1"]) * p["bn1_s"] + p["bn1_b"]
            h = h + p["w_dw"][:, c:c + 1] * acc
        h = elu((h + p["b_dw"]) * p["bn2_s"] + p["bn2_b"])
        z = pool2(h)

        def tower12(pre):
            t = pw(z, p[pre + "_pw_w"], p[pre + "_pw_b"])
            t = sep(t, pre + "_s1")
            t = elu(t * p[pre + "_bn_s"] + p[pre + "_bn_b"])
            t = sep(t, pre + "_s2")
            return pool2(t)

        t1 = tower12("t1")
        t2 = tower12("t2")
        t3 = pw(pool2(z), p["t3_pw_w"], p["t3_pw_b"])
        t4 = pw(z[:, ::2], p["t4_pw_w"], p["t4_pw_b"])
        zc = jnp.concatenate([t1, t2, t3, t4], axis=0)
        zc = elu(zc * p["c2_bn1_s"] + p["c2_bn1_b"])
        zc = sep(zc, "c2_s")
        zc = elu(zc * p["c2_bn2_s"] + p["c2_bn2_b"])
        outs.append((gm @ zc.sum(axis=1)) / float(GRP * T2))
    return jnp.stack(outs)


# ----------------------------- main ------------------------------------------
if __name__ == "__main__":
    key = jax.random.PRNGKey(0)
    key, kx, kp = jax.random.split(key, 3)
    x = jax.random.normal(kx, (BATCH, NUM_CHANNEL, SIGNAL_LEN), dtype=jnp.float32)
    params = init_params(kp)

    y = mieegnet_forward(x, params)
    y = jax.block_until_ready(y)
    assert y.shape == (BATCH, NUM_CLASSES), y.shape
    assert bool(jnp.all(jnp.isfinite(y)))

    # sanity check against the original (unfolded) op ordering
    y_ref = reference_forward(x, params)
    err = float(jnp.max(jnp.abs(y - y_ref)))
    assert err < 1e-3, f"mismatch vs reference: {err}"

    print("KERNEL_OK")
</pallas_src>

<mosaic_0001>
module attributes {stable_mosaic.version = 11 : i64} {
  func.func @kernel(%arg0: i32, %arg1: memref<4x32xf32, #tpu.memory_space<vmem>>, %arg2: memref<584x32xf32, #tpu.memory_space<vmem>>, %arg3: memref<32x14xf32, #tpu.memory_space<vmem>>, %arg4: memref<912x32xf32, #tpu.memory_space<vmem>>, %arg5: memref<4x2xf32, #tpu.memory_space<vmem>>, %arg6: memref<32x8xf32, #tpu.memory_space<vmem>>) attributes {dimension_semantics = [#tpu.dimension_semantics<parallel>], iteration_bounds = array<i64: 1>, scalar_prefetch = 0 : i64, scratch_operands = 1 : i64, tpu.core_type = #tpu.core_type<tc>, window_params = [{transform_indices = @transform_0, window_bounds = array<i64: 4, 32>}, {pipeline_mode = #tpu.pipeline_mode<synchronous>, transform_indices = @transform_1, window_bounds = array<i64: 584, 32>}, {pipeline_mode = #tpu.pipeline_mode<synchronous>, transform_indices = @transform_2, window_bounds = array<i64: 32, 14>}, {pipeline_mode = #tpu.pipeline_mode<synchronous>, transform_indices = @transform_3, window_bounds = array<i64: 912, 32>}, {transform_indices = @transform_4, window_bounds = array<i64: 4, 2>}]} {
    %c0 = arith.constant 0 : index
    %c0_0 = arith.constant 0 : index
    %0 = vector.load %arg1[%c0, %c0_0] : memref<4x32xf32, #tpu.memory_space<vmem>>, vector<4x32xf32>
    %c0_1 = arith.constant 0 : index
    %c0_2 = arith.constant 0 : index
    %1 = vector.load %arg2[%c0_1, %c0_2] : memref<584x32xf32, #tpu.memory_space<vmem>>, vector<128x4xf32>
    %cst = arith.constant dense<0.000000e+00> : vector<128x32xf32>
    %2 = tpu.matmul %1, %0, %cst {dimension_numbers = #tpu.dot_dimension_numbers<[1], [0], [0], [1], [0, 0, 1, 1], [], []>} : vector<128x4xf32>, vector<4x32xf32>, vector<128x32xf32> -> vector<128x32xf32>
    %3 = vector.extract_strided_slice %2 {offsets = [0, 0], sizes = [8, 32], strides = [1, 1]} : vector<128x32xf32> to vector<8x32xf32>
    %c0_3 = arith.constant 0 : index
    %c0_4 = arith.constant 0 : index
    %4 = vector.load %arg4[%c0_3, %c0_4] : memref<912x32xf32, #tpu.memory_space<vmem>>, vector<32x32xf32>
    %cst_5 = arith.constant dense<0.000000e+00> : vector<8x32xf32>
    %5 = tpu.matmul %3, %4, %cst_5 {dimension_numbers = #tpu.dot_dimension_numbers<[1], [0], [0], [1], [0, 0, 1, 1], [], []>} : vector<8x32xf32>, vector<32x32xf32>, vector<8x32xf32> -> vector<8x32xf32>
    %6 = vector.extract_strided_slice %2 {offsets = [8, 0], sizes = [8, 32], strides = [1, 1]} : vector<128x32xf32> to vector<8x32xf32>
    %c32 = arith.constant 32 : index
    %c0_6 = arith.constant 0 : index
    %7 = vector.load %arg4[%c32, %c0_6] : memref<912x32xf32, #tpu.memory_space<vmem>>, vector<32x32xf32>
    %cst_7 = arith.constant dense<0.000000e+00> : vector<8x32xf32>
    %8 = tpu.matmul %6, %7, %cst_7 {dimension_numbers = #tpu.dot_dimension_numbers<[1], [0], [0], [1], [0, 0, 1, 1], [], []>} : vector<8x32xf32>, vector<32x32xf32>, vector<8x32xf32> -> vector<8x32xf32>
    %9 = arith.addf %5, %8 : vector<8x32xf32>
    %10 = vector.extract_strided_slice %2 {offsets = [16, 0], sizes = [8, 32], strides = [1, 1]} : vector<128x32xf32> to vector<8x32xf32>
    %c64 = arith.constant 64 : index
    %c0_8 = arith.constant 0 : index
    %11 = vector.load %arg4[%c64, %c0_8] : memref<912x32xf32, #tpu.memory_space<vmem>>, vector<32x32xf32>
    %cst_9 = arith.constant dense<0.000000e+00> : vector<8x32xf32>
    %12 = tpu.matmul %10, %11, %cst_9 {dimension_numbers = #tpu.dot_dimension_numbers<[1], [0], [0], [1], [0, 0, 1, 1], [], []>} : vector<8x32xf32>, vector<32x32xf32>, vector<8x32xf32> -> vector<8x32xf32>
    %13 = arith.addf %9, %12 : vector<8x32xf32>
    %14 = vector.extract_strided_slice %2 {offsets = [24, 0], sizes = [8, 32], strides = [1, 1]} : vector<128x32xf32> to vector<8x32xf32>
    %c96 = arith.constant 96 : index
    %c0_10 = arith.constant 0 : index
    %15 = vector.load %arg4[%c96, %c0_10] : memref<912x32xf32, #tpu.memory_space<vmem>>, vector<32x32xf32>
    %cst_11 = arith.constant dense<0.000000e+00> : vector<8x32xf32>
    %16 = tpu.matmul %14, %15, %cst_11 {dimension_numbers = #tpu.dot_dimension_numbers<[1], [0], [0], [1], [0, 0, 1, 1], [], []>} : vector<8x32xf32>, vector<32x32xf32>, vector<8x32xf32> -> vector<8x32xf32>
    %17 = arith.addf %13, %16 : vector<8x32xf32>
    %18 = vector.extract_strided_slice %2 {offsets = [32, 0], sizes = [8, 32], strides = [1, 1]} : vector<128x32xf32> to vector<8x32xf32>
    %c128 = arith.constant 128 : index
    %c0_12 = arith.constant 0 : index
    %19 = vector.load %arg4[%c128, %c0_12] : memref<912x32xf32, #tpu.memory_space<vmem>>, vector<32x32xf32>
    %cst_13 = arith.constant dense<0.000000e+00> : vector<8x32xf32>
    %20 = tpu.matmul %18, %19, %cst_13 {dimension_numbers = #tpu.dot_dimension_numbers<[1], [0], [0], [1], [0, 0, 1, 1], [], []>} : vector<8x32xf32>, vector<32x32xf32>, vector<8x32xf32> -> vector<8x32xf32>
    %21 = arith.addf %17, %20 : vector<8x32xf32>
    %22 = vector.extract_strided_slice %2 {offsets = [40, 0], sizes = [8, 32], strides = [1, 1]} : vector<128x32xf32> to vector<8x32xf32>
    %c160 = arith.constant 160 : index
    %c0_14 = arith.constant 0 : index
    %23 = vector.load %arg4[%c160, %c0_14] : memref<912x32xf32, #tpu.memory_space<vmem>>, vector<32x32xf32>
    %cst_15 = arith.constant dense<0.000000e+00> : vector<8x32xf32>
    %24 = tpu.matmul %22, %23, %cst_15 {dimension_numbers = #tpu.dot_dimension_numbers<[1], [0], [0], [1], [0, 0, 1, 1], [], []>} : vector<8x32xf32>, vector<32x32xf32>, vector<8x32xf32> -> vector<8x32xf32>
    %25 = arith.addf %21, %24 : vector<8x32xf32>
    %26 = vector.extract_strided_slice %2 {offsets = [48, 0], sizes = [8, 32], strides = [1, 1]} : vector<128x32xf32> to vector<8x32xf32>
    %c192 = arith.constant 192 : index
    %c0_16 = arith.constant 0 : index
    %27 = vector.load %arg4[%c192, %c0_16] : memref<912x32xf32, #tpu.memory_space<vmem>>, vector<32x32xf32>
    %cst_17 = arith.constant dense<0.000000e+00> : vector<8x32xf32>
    %28 = tpu.matmul %26, %27, %cst_17 {dimension_numbers = #tpu.dot_dimension_numbers<[1], [0], [0], [1], [0, 0, 1, 1], [], []>} : vector<8x32xf32>, vector<32x32xf32>, vector<8x32xf32> -> vector<8x32xf32>
    %29 = arith.addf %25, %28 : vector<8x32xf32>
    %30 = vector.extract_strided_slice %2 {offsets = [56, 0], sizes = [8, 32], strides = [1, 1]} : vector<128x32xf32> to vector<8x32xf32>
    %c224 = arith.constant 224 : index
    %c0_18 = arith.constant 0 : index
    %31 = vector.load %arg4[%c224, %c0_18] : memref<912x32xf32, #tpu.memory_space<vmem>>, vector<32x32xf32>
    %cst_19 = arith.constant dense<0.000000e+00> : vector<8x32xf32>
    %32 = tpu.matmul %30, %31, %cst_19 {dimension_numbers = #tpu.dot_dimension_numbers<[1], [0], [0], [1], [0, 0, 1, 1], [], []>} : vector<8x32xf32>, vector<32x32xf32>, vector<8x32xf32> -> vector<8x32xf32>
    %33 = arith.addf %29, %32 : vector<8x32xf32>
    %34 = vector.extract_strided_slice %2 {offsets = [64, 0], sizes = [8, 32], strides = [1, 1]} : vector<128x32xf32> to vector<8x32xf32>
    %c256 = arith.constant 256 : index
    %c0_20 = arith.constant 0 : index
    %35 = vector.load %arg4[%c256, %c0_20] : memref<912x32xf32, #tpu.memory_space<vmem>>, vector<32x32xf32>
    %cst_21 = arith.constant dense<0.000000e+00> : vector<8x32xf32>
    %36 = tpu.matmul %34, %35, %cst_21 {dimension_numbers = #tpu.dot_dimension_numbers<[1], [0], [0], [1], [0, 0, 1, 1], [], []>} : vector<8x32xf32>, vector<32x32xf32>, vector<8x32xf32> -> vector<8x32xf32>
    %37 = arith.addf %33, %36 : vector<8x32xf32>
    %38 = vector.extract_strided_slice %2 {offsets = [72, 0], sizes = [8, 32], strides = [1, 1]} : vector<128x32xf32> to vector<8x32xf32>
    %c288 = arith.constant 288 : index
    %c0_22 = arith.constant 0 : index
    %39 = vector.load %arg4[%c288, %c0_22] : memref<912x32xf32, #tpu.memory_space<vmem>>, vector<32x32xf32>
    %cst_23 = arith.constant dense<0.000000e+00> : vector<8x32xf32>
    %40 = tpu.matmul %38, %39, %cst_23 {dimension_numbers = #tpu.dot_dimension_numbers<[1], [0], [0], [1], [0, 0, 1, 1], [], []>} : vector<8x32xf32>, vector<32x32xf32>, vector<8x32xf32> -> vector<8x32xf32>
    %41 = arith.addf %37, %40 : vector<8x32xf32>
    %42 = vector.extract_strided_slice %2 {offsets = [80, 0], sizes = [8, 32], strides = [1, 1]} : vector<128x32xf32> to vector<8x32xf32>
    %c320 = arith.constant 320 : index
    %c0_24 = arith.constant 0 : index
    %43 = vector.load %arg4[%c320, %c0_24] : memref<912x32xf32, #tpu.memory_space<vmem>>, vector<32x32xf32>
    %cst_25 = arith.constant dense<0.000000e+00> : vector<8x32xf32>
    %44 = tpu.matmul %42, %43, %cst_25 {dimension_numbers = #tpu.dot_dimension_numbers<[1], [0], [0], [1], [0, 0, 1, 1], [], []>} : vector<8x32xf32>, vector<32x32xf32>, vector<8x32xf32> -> vector<8x32xf32>
    %45 = arith.addf %41, %44 : vector<8x32xf32>
    %46 = vector.extract_strided_slice %2 {offsets = [88, 0], sizes = [8, 32], strides = [1, 1]} : vector<128x32xf32> to vector<8x32xf32>
    %c352 = arith.constant 352 : index
    %c0_26 = arith.constant 0 : index
    %47 = vector.load %arg4[%c352, %c0_26] : memref<912x32xf32, #tpu.memory_space<vmem>>, vector<32x32xf32>
    %cst_27 = arith.constant dense<0.000000e+00> : vector<8x32xf32>
    %48 = tpu.matmul %46, %47, %cst_27 {dimension_numbers = #tpu.dot_dimension_numbers<[1], [0], [0], [1], [0, 0, 1, 1], [], []>} : vector<8x32xf32>, vector<32x32xf32>, vector<8x32xf32> -> vector<8x32xf32>
    %49 = arith.addf %45, %48 : vector<8x32xf32>
    %50 = vector.extract_strided_slice %2 {offsets = [96, 0], sizes = [8, 32], strides = [1, 1]} : vector<128x32xf32> to vector<8x32xf32>
    %c384 = arith.constant 384 : index
    %c0_28 = arith.constant 0 : index
    %51 = vector.load %arg4[%c384, %c0_28] : memref<912x32xf32, #tpu.memory_space<vmem>>, vector<32x32xf32>
    %cst_29 = arith.constant dense<0.000000e+00> : vector<8x32xf32>
    %52 = tpu.matmul %50, %51, %cst_29 {dimension_numbers = #tpu.dot_dimension_numbers<[1], [0], [0], [1], [0, 0, 1, 1], [], []>} : vector<8x32xf32>, vector<32x32xf32>, vector<8x32xf32> -> vector<8x32xf32>
    %53 = arith.addf %49, %52 : vector<8x32xf32>
    %54 = vector.extract_strided_slice %2 {offsets = [104, 0], sizes = [8, 32], strides = [1, 1]} : vector<128x32xf32> to vector<8x32xf32>
    %c416 = arith.constant 416 : index
    %c0_30 = arith.constant 0 : index
    %55 = vector.load %arg4[%c416, %c0_30] : memref<912x32xf32, #tpu.memory_space<vmem>>, vector<32x32xf32>
    %cst_31 = arith.constant dense<0.000000e+00> : vector<8x32xf32>
    %56 = tpu.matmul %54, %55, %cst_31 {dimension_numbers = #tpu.dot_dimension_numbers<[1], [0], [0], [1], [0, 0, 1, 1], [], []>} : vector<8x32xf32>, vector<32x32xf32>, vector<8x32xf32> -> vector<8x32xf32>
    %57 = arith.addf %53, %56 : vector<8x32xf32>
    %58 = vector.extract_strided_slice %2 {offsets = [112, 0], sizes = [8, 32], strides = [1, 1]} : vector<128x32xf32> to vector<8x32xf32>
    %c448 = arith.constant 448 : index
    %c0_32 = arith.constant 0 : index
    %59 = vector.load %arg4[%c448, %c0_32] : memref<912x32xf32, #tpu.memory_space<vmem>>, vector<32x32xf32>
    %cst_33 = arith.constant dense<0.000000e+00> : vector<8x32xf32>
    %60 = tpu.matmul %58, %59, %cst_33 {dimension_numbers = #tpu.dot_dimension_numbers<[1], [0], [0], [1], [0, 0, 1, 1], [], []>} : vector<8x32xf32>, vector<32x32xf32>, vector<8x32xf32> -> vector<8x32xf32>
    %61 = arith.addf %57, %60 : vector<8x32xf32>
    %62 = vector.extract_strided_slice %2 {offsets = [120, 0], sizes = [8, 32], strides = [1, 1]} : vector<128x32xf32> to vector<8x32xf32>
    %c480 = arith.constant 480 : index
    %c0_34 = arith.constant 0 : index
    %63 = vector.load %arg4[%c480, %c0_34] : memref<912x32xf32, #tpu.memory_space<vmem>>, vector<32x32xf32>
    %cst_35 = arith.constant dense<0.000000e+00> : vector<8x32xf32>
    %64 = tpu.matmul %62, %63, %cst_35 {dimension_numbers = #tpu.dot_dimension_numbers<[1], [0], [0], [1], [0, 0, 1, 1], [], []>} : vector<8x32xf32>, vector<32x32xf32>, vector<8x32xf32> -> vector<8x32xf32>
    %65 = arith.addf %61, %64 : vector<8x32xf32>
    %c0_36 = arith.constant 0 : index
    %c0_37 = arith.constant 0 : index
    %66 = vector.load %arg3[%c0_36, %c0_37] : memref<32x14xf32, #tpu.memory_space<vmem>>, vector<8x1xf32>
    %67 = vector.broadcast %66 : vector<8x1xf32> to vector<8x32xf32>
    %68 = arith.addf %65, %67 : vector<8x32xf32>
    %cst_38 = arith.constant 0.000000e+00 : f32
    %69 = vector.broadcast %cst_38 : f32 to vector<8x32xf32>
    %70 = arith.cmpf ogt, %68, %69 : vector<8x32xf32>
    %71 = math.exp %68 : vector<8x32xf32>
    %cst_39 = arith.constant 1.000000e+00 : f32
    %72 = vector.broadcast %cst_39 : f32 to vector<8x32xf32>
    %73 = arith.subf %71, %72 : vector<8x32xf32>
    %74 = arith.select %70, %68, %73 : vector<8x32xi1>, vector<8x32xf32>
    %c840 = arith.constant 840 : index
    %c0_40 = arith.constant 0 : index
    %75 = vector.load %arg4[%c840, %c0_40] : memref<912x32xf32, #tpu.memory_space<vmem>>, vector<32x16xf32>
    %cst_41 = arith.constant dense<0.000000e+00> : vector<8x16xf32>
    %76 = tpu.matmul %74, %75, %cst_41 {dimension_numbers = #tpu.dot_dimension_numbers<[1], [0], [0], [1], [0, 0, 1, 1], [], []>} : vector<8x32xf32>, vector<32x16xf32>, vector<8x16xf32> -> vector<8x16xf32>
    %c128_42 = arith.constant 128 : index
    %c0_43 = arith.constant 0 : index
    %77 = vector.load %arg2[%c128_42, %c0_43] : memref<584x32xf32, #tpu.memory_space<vmem>>, vector<8x8xf32>
    %cst_44 = arith.constant dense<0.000000e+00> : vector<8x16xf32>
    %78 = tpu.matmul %77, %76, %cst_44 {dimension_numbers = #tpu.dot_dimension_numbers<[1], [0], [0], [1], [0, 0, 1, 1], [], []>} : vector<8x8xf32>, vector<8x16xf32>, vector<8x16xf32> -> vector<8x16xf32>
    %c0_45 = arith.constant 0 : index
    %c1 = arith.constant 1 : index
    %79 = vector.load %arg3[%c0_45, %c1] : memref<32x14xf32, #tpu.memory_space<vmem>>, vector<8x1xf32>
    %80 = vector.broadcast %79 : vector<8x1xf32> to vector<8x16xf32>
    %81 = arith.addf %78, %80 : vector<8x16xf32>
    %c144 = arith.constant 144 : index
    %c0_46 = arith.constant 0 : index
    %82 = vector.load %arg2[%c144, %c0_46] : memref<584x32xf32, #tpu.memory_space<vmem>>, vector<56x8xf32>
    %cst_47 = arith.constant dense<0.000000e+00> : vector<56x16xf32>
    %83 = tpu.matmul %82, %81, %cst_47 {dimension_numbers = #tpu.dot_dimension_numbers<[1], [0], [0], [1], [0, 0, 1, 1], [], []>} : vector<56x8xf32>, vector<8x16xf32>, vector<56x16xf32> -> vector<56x16xf32>
    %84 = vector.extract_strided_slice %83 {offsets = [0, 0], sizes = [8, 16], strides = [1, 1]} : vector<56x16xf32> to vector<8x16xf32>
    %c528 = arith.constant 528 : index
    %c0_48 = arith.constant 0 : index
    %85 = vector.load %arg4[%c528, %c0_48] : memref<912x32xf32, #tpu.memory_space<vmem>>, vector<16x16xf32>
    %cst_49 = arith.constant dense<0.000000e+00> : vector<8x16xf32>
    %86 = tpu.matmul %84, %85, %cst_49 {dimension_numbers = #tpu.dot_dimension_numbers<[1], [0], [0], [1], [0, 0, 1, 1], [], []>} : vector<8x16xf32>, vector<16x16xf32>, vector<8x16xf32> -> vector<8x16xf32>
    %87 = vector.extract_strided_slice %83 {offsets = [8, 0], sizes = [8, 16], strides = [1, 1]} : vector<56x16xf32> to vector<8x16xf32>
    %c544 = arith.constant 544 : index
    %c0_50 = arith.constant 0 : index
    %88 = vector.load %arg4[%c544, %c0_50] : memref<912x32xf32, #tpu.memory_space<vmem>>, vector<16x16xf32>
    %cst_51 = arith.constant dense<0.000000e+00> : vector<8x16xf32>
    %89 = tpu.matmul %87, %88, %cst_51 {dimension_numbers = #tpu.dot_dimension_numbers<[1], [0], [0], [1], [0, 0, 1, 1], [], []>} : vector<8x16xf32>, vector<16x16xf32>, vector<8x16xf32> -> vector<8x16xf32>
    %90 = arith.addf %86, %89 : vector<8x16xf32>
    %91 = vector.extract_strided_slice %83 {offsets = [16, 0], sizes = [8, 16], strides = [1, 1]} : vector<56x16xf32> to vector<8x16xf32>
    %c560 = arith.constant 560 : index
    %c0_52 = arith.constant 0 : index
    %92 = vector.load %arg4[%c560, %c0_52] : memref<912x32xf32, #tpu.memory_space<vmem>>, vector<16x16xf32>
    %cst_53 = arith.constant dense<0.000000e+00> : vector<8x16xf32>
    %93 = tpu.matmul %91, %92, %cst_53 {dimension_numbers = #tpu.dot_dimension_numbers<[1], [0], [0], [1], [0, 0, 1, 1], [], []>} : vector<8x16xf32>, vector<16x16xf32>, vector<8x16xf32> -> vector<8x16xf32>
    %94 = arith.addf %90, %93 : vector<8x16xf32>
    %95 = vector.extract_strided_slice %83 {offsets = [24, 0], sizes = [8, 16], strides = [1, 1]} : vector<56x16xf32> to vector<8x16xf32>
    %c576 = arith.constant 576 : index
    %c0_54 = arith.constant 0 : index
    %96 = vector.load %arg4[%c576, %c0_54] : memref<912x32xf32, #tpu.memory_space<vmem>>, vector<16x16xf32>
    %cst_55 = arith.constant dense<0.000000e+00> : vector<8x16xf32>
    %97 = tpu.matmul %95, %96, %cst_55 {dimension_numbers = #tpu.dot_dimension_numbers<[1], [0], [0], [1], [0, 0, 1, 1], [], []>} : vector<8x16xf32>, vector<16x16xf32>, vector<8x16xf32> -> vector<8x16xf32>
    %98 = arith.addf %94, %97 : vector<8x16xf32>
    %99 = vector.extract_strided_slice %83 {offsets = [32, 0], sizes = [8, 16], strides = [1, 1]} : vector<56x16xf32> to vector<8x16xf32>
    %c592 = arith.constant 592 : index
    %c0_56 = arith.constant 0 : index
    %100 = vector.load %arg4[%c592, %c0_56] : memref<912x32xf32, #tpu.memory_space<vmem>>, vector<16x16xf32>
    %cst_57 = arith.constant dense<0.000000e+00> : vector<8x16xf32>
    %101 = tpu.matmul %99, %100, %cst_57 {dimension_numbers = #tpu.dot_dimension_numbers<[1], [0], [0], [1], [0, 0, 1, 1], [], []>} : vector<8x16xf32>, vector<16x16xf32>, vector<8x16xf32> -> vector<8x16xf32>
    %102 = arith.addf %98, %101 : vector<8x16xf32>
    %103 = vector.extract_strided_slice %83 {offsets = [40, 0], sizes = [8, 16], strides = [1, 1]} : vector<56x16xf32> to vector<8x16xf32>
    %c608 = arith.constant 608 : index
    %c0_58 = arith.constant 0 : index
    %104 = vector.load %arg4[%c608, %c0_58] : memref<912x32xf32, #tpu.memory_space<vmem>>, vector<16x16xf32>
    %cst_59 = arith.constant dense<0.000000e+00> : vector<8x16xf32>
    %105 = tpu.matmul %103, %104, %cst_59 {dimension_numbers = #tpu.dot_dimension_numbers<[1], [0], [0], [1], [0, 0, 1, 1], [], []>} : vector<8x16xf32>, vector<16x16xf32>, vector<8x16xf32> -> vector<8x16xf32>
    %106 = arith.addf %102, %105 : vector<8x16xf32>
    %107 = vector.extract_strided_slice %83 {offsets = [48, 0], sizes = [8, 16], strides = [1, 1]} : vector<56x16xf32> to vector<8x16xf32>
    %c624 = arith.constant 624 : index
    %c0_60 = arith.constant 0 : index
    %108 = vector.load %arg4[%c624, %c0_60] : memref<912x32xf32, #tpu.memory_space<vmem>>, vector<16x16xf32>
    %cst_61 = arith.constant dense<0.000000e+00> : vector<8x16xf32>
    %109 = tpu.matmul %107, %108, %cst_61 {dimension_numbers = #tpu.dot_dimension_numbers<[1], [0], [0], [1], [0, 0, 1, 1], [], []>} : vector<8x16xf32>, vector<16x16xf32>, vector<8x16xf32> -> vector<8x16xf32>
    %110 = arith.addf %106, %109 : vector<8x16xf32>
    %c0_62 = arith.constant 0 : index
    %c3 = arith.constant 3 : index
    %111 = vector.load %arg3[%c0_62, %c3] : memref<32x14xf32, #tpu.memory_space<vmem>>, vector<8x1xf32>
    %112 = vector.broadcast %111 : vector<8x1xf32> to vector<8x16xf32>
    %113 = arith.addf %110, %112 : vector<8x16xf32>
    %cst_63 = arith.constant 0.000000e+00 : f32
    %114 = vector.broadcast %cst_63 : f32 to vector<8x16xf32>
    %115 = arith.cmpf ogt, %113, %114 : vector<8x16xf32>
    %116 = math.exp %113 : vector<8x16xf32>
    %cst_64 = arith.constant 1.000000e+00 : f32
    %117 = vector.broadcast %cst_64 : f32 to vector<8x16xf32>
    %118 = arith.subf %116, %117 : vector<8x16xf32>
    %119 = arith.select %115, %113, %118 : vector<8x16xi1>, vector<8x16xf32>
    %c200 = arith.constant 200 : index
    %c0_65 = arith.constant 0 : index
    %120 = vector.load %arg2[%c200, %c0_65] : memref<584x32xf32, #tpu.memory_space<vmem>>, vector<56x8xf32>
    %cst_66 = arith.constant dense<0.000000e+00> : vector<56x16xf32>
    %121 = tpu.matmul %120, %119, %cst_66 {dimension_numbers = #tpu.dot_dimension_numbers<[1], [0], [0], [1], [0, 0, 1, 1], [], []>} : vector<56x8xf32>, vector<8x16xf32>, vector<56x16xf32> -> vector<56x16xf32>
    %122 = vector.extract_strided_slice %121 {offsets = [0, 0], sizes = [8, 16], strides = [1, 1]} : vector<56x16xf32> to vector<8x16xf32>
    %c672 = arith.constant 672 : index
    %c0_67 = arith.constant 0 : index
    %123 = vector.load %arg4[%c672, %c0_67] : memref<912x32xf32, #tpu.memory_space<vmem>>, vector<16x8xf32>
    %cst_68 = arith.constant dense<0.000000e+00> : vector<8x8xf32>
    %124 = tpu.matmul %122, %123, %cst_68 {dimension_numbers = #tpu.dot_dimension_numbers<[1], [0], [0], [1], [0, 0, 1, 1], [], []>} : vector<8x16xf32>, vector<16x8xf32>, vector<8x8xf32> -> vector<8x8xf32>
    %125 = vector.extract_strided_slice %121 {offsets = [8, 0], sizes = [8, 16], strides = [1, 1]} : vector<56x16xf32> to vector<8x16xf32>
    %c688 = arith.constant 688 : index
    %c0_69 = arith.constant 0 : index
    %126 = vector.load %arg4[%c688, %c0_69] : memref<912x32xf32, #tpu.memory_space<vmem>>, vector<16x8xf32>
    %cst_70 = arith.constant dense<0.000000e+00> : vector<8x8xf32>
    %127 = tpu.matmul %125, %126, %cst_70 {dimension_numbers = #tpu.dot_dimension_numbers<[1], [0], [0], [1], [0, 0, 1, 1], [], []>} : vector<8x16xf32>, vector<16x8xf32>, vector<8x8xf32> -> vector<8x8xf32>
    %128 = arith.addf %124, %127 : vector<8x8xf32>
    %129 = vector.extract_strided_slice %121 {offsets = [16, 0], sizes = [8, 16], strides = [1, 1]} : vector<56x16xf32> to vector<8x16xf32>
    %c704 = arith.constant 704 : index
    %c0_71 = arith.constant 0 : index
    %130 = vector.load %arg4[%c704, %c0_71] : memref<912x32xf32, #tpu.memory_space<vmem>>, vector<16x8xf32>
    %cst_72 = arith.constant dense<0.000000e+00> : vector<8x8xf32>
    %131 = tpu.matmul %129, %130, %cst_72 {dimension_numbers = #tpu.dot_dimension_numbers<[1], [0], [0], [1], [0, 0, 1, 1], [], []>} : vector<8x16xf32>, vector<16x8xf32>, vector<8x8xf32> -> vector<8x8xf32>
    %132 = arith.addf %128, %131 : vector<8x8xf32>
    %133 = vector.extract_strided_slice %121 {offsets = [24, 0], sizes = [8, 16], strides = [1, 1]} : vector<56x16xf32> to vector<8x16xf32>
    %c720 = arith.constant 720 : index
    %c0_73 = arith.constant 0 : index
    %134 = vector.load %arg4[%c720, %c0_73] : memref<912x32xf32, #tpu.memory_space<vmem>>, vector<16x8xf32>
    %cst_74 = arith.constant dense<0.000000e+00> : vector<8x8xf32>
    %135 = tpu.matmul %133, %134, %cst_74 {dimension_numbers = #tpu.dot_dimension_numbers<[1], [0], [0], [1], [0, 0, 1, 1], [], []>} : vector<8x16xf32>, vector<16x8xf32>, vector<8x8xf32> -> vector<8x8xf32>
    %136 = arith.addf %132, %135 : vector<8x8xf32>
    %137 = vector.extract_strided_slice %121 {offsets = [32, 0], sizes = [8, 16], strides = [1, 1]} : vector<56x16xf32> to vector<8x16xf32>
    %c736 = arith.constant 736 : index
    %c0_75 = arith.constant 0 : index
    %138 = vector.load %arg4[%c736, %c0_75] : memref<912x32xf32, #tpu.memory_space<vmem>>, vector<16x8xf32>
    %cst_76 = arith.constant dense<0.000000e+00> : vector<8x8xf32>
    %139 = tpu.matmul %137, %138, %cst_76 {dimension_numbers = #tpu.dot_dimension_numbers<[1], [0], [0], [1], [0, 0, 1, 1], [], []>} : vector<8x16xf32>, vector<16x8xf32>, vector<8x8xf32> -> vector<8x8xf32>
    %140 = arith.addf %136, %139 : vector<8x8xf32>
    %141 = vector.extract_strided_slice %121 {offsets = [40, 0], sizes = [8, 16], strides = [1, 1]} : vector<56x16xf32> to vector<8x16xf32>
    %c752 = arith.constant 752 : index
    %c0_77 = arith.constant 0 : index
    %142 = vector.load %arg4[%c752, %c0_77] : memref<912x32xf32, #tpu.memory_space<vmem>>, vector<16x8xf32>
    %cst_78 = arith.constant dense<0.000000e+00> : vector<8x8xf32>
    %143 = tpu.matmul %141, %142, %cst_78 {dimension_numbers = #tpu.dot_dimension_numbers<[1], [0], [0], [1], [0, 0, 1, 1], [], []>} : vector<8x16xf32>, vector<16x8xf32>, vector<8x8xf32> -> vector<8x8xf32>
    %144 = arith.addf %140, %143 : vector<8x8xf32>
    %145 = vector.extract_strided_slice %121 {offsets = [48, 0], sizes = [8, 16], strides = [1, 1]} : vector<56x16xf32> to vector<8x16xf32>
    %c768 = arith.constant 768 : index
    %c0_79 = arith.constant 0 : index
    %146 = vector.load %arg4[%c768, %c0_79] : memref<912x32xf32, #tpu.memory_space<vmem>>, vector<16x8xf32>
    %cst_80 = arith.constant dense<0.000000e+00> : vector<8x8xf32>
    %147 = tpu.matmul %145, %146, %cst_80 {dimension_numbers = #tpu.dot_dimension_numbers<[1], [0], [0], [1], [0, 0, 1, 1], [], []>} : vector<8x16xf32>, vector<16x8xf32>, vector<8x8xf32> -> vector<8x8xf32>
    %148 = arith.addf %144, %147 : vector<8x8xf32>
    %c0_81 = arith.constant 0 : index
    %c4 = arith.constant 4 : index
    %149 = vector.load %arg3[%c0_81, %c4] : memref<32x14xf32, #tpu.memory_space<vmem>>, vector<8x1xf32>
    %150 = vector.broadcast %149 : vector<8x1xf32> to vector<8x8xf32>
    %151 = arith.addf %148, %150 : vector<8x8xf32>
    %c0_82 = arith.constant 0 : index
    %c0_83 = arith.constant 0 : index
    %152 = vector.load %arg6[%c0_82, %c0_83] : memref<32x8xf32, #tpu.memory_space<vmem>>, vector<8x8xf32>
    tpu.vector_store %arg6[%c0_82, %c0_83], %151 {strides = array<i32>} : memref<32x8xf32, #tpu.memory_space<vmem>>, vector<8x8xf32>,
    %c136 = arith.constant 136 : index
    %c0_84 = arith.constant 0 : index
    %153 = vector.load %arg2[%c136, %c0_84] : memref<584x32xf32, #tpu.memory_space<vmem>>, vector<8x8xf32>
    %cst_85 = arith.constant dense<0.000000e+00> : vector<8x16xf32>
    %154 = tpu.matmul %153, %76, %cst_85 {dimension_numbers = #tpu.dot_dimension_numbers<[1], [0], [0], [1], [0, 0, 1, 1], [], []>} : vector<8x8xf32>, vector<8x16xf32>, vector<8x16xf32> -> vector<8x16xf32>
    %c0_86 = arith.constant 0 : index
    %c2 = arith.constant 2 : index
    %155 = vector.load %arg3[%c0_86, %c2] : memref<32x14xf32, #tpu.memory_space<vmem>>, vector<8x1xf32>
    %156 = vector.broadcast %155 : vector<8x1xf32> to vector<8x16xf32>
    %157 = arith.addf %154, %156 : vector<8x16xf32>
    %c256_87 = arith.constant 256 : index
    %c0_88 = arith.constant 0 : index
    %158 = vector.load %arg2[%c256_87, %c0_88] : memref<584x32xf32, #tpu.memory_space<vmem>>, vector<72x8xf32>
    %cst_89 = arith.constant dense<0.000000e+00> : vector<72x16xf32>
    %159 = tpu.matmul %158, %157, %cst_89 {dimension_numbers = #tpu.dot_dimension_numbers<[1], [0], [0], [1], [0, 0, 1, 1], [], []>} : vector<72x8xf32>, vector<8x16xf32>, vector<72x16xf32> -> vector<72x16xf32>
    %160 = vector.extract_strided_slice %159 {offsets = [0, 0], sizes = [8, 16], strides = [1, 1]} : vector<72x16xf32> to vector<8x16xf32>
    %c512 = arith.constant 512 : index
    %c0_90 = arith.constant 0 : index
    %161 = vector.load %arg4[%c512, %c0_90] : memref<912x32xf32, #tpu.memory_space<vmem>>, vector<16x16xf32>
    %cst_91 = arith.constant dense<0.000000e+00> : vector<8x16xf32>
    %162 = tpu.matmul %160, %161, %cst_91 {dimension_numbers = #tpu.dot_dimension_numbers<[1], [0], [0], [1], [0, 0, 1, 1], [], []>} : vector<8x16xf32>, vector<16x16xf32>, vector<8x16xf32> -> vector<8x16xf32>
    %163 = vector.extract_strided_slice %159 {offsets = [8, 0], sizes = [8, 16], strides = [1, 1]} : vector<72x16xf32> to vector<8x16xf32>
    %c528_92 = arith.constant 528 : index
    %c0_93 = arith.constant 0 : index
    %164 = vector.load %arg4[%c528_92, %c0_93] : memref<912x32xf32, #tpu.memory_space<vmem>>, vector<16x16xf32>
    %cst_94 = arith.constant dense<0.000000e+00> : vector<8x16xf32>
    %165 = tpu.matmul %163, %164, %cst_94 {dimension_numbers = #tpu.dot_dimension_numbers<[1], [0], [0], [1], [0, 0, 1, 1], [], []>} : vector<8x16xf32>, vector<16x16xf32>, vector<8x16xf32> -> vector<8x16xf32>
    %166 = arith.addf %162, %165 : vector<8x16xf32>
    %167 = vector.extract_strided_slice %159 {offsets = [16, 0], sizes = [8, 16], strides = [1, 1]} : vector<72x16xf32> to vector<8x16xf32>
    %c544_95 = arith.constant 544 : index
    %c0_96 = arith.constant 0 : index
    %168 = vector.load %arg4[%c544_95, %c0_96] : memref<912x32xf32, #tpu.memory_space<vmem>>, vector<16x16xf32>
    %cst_97 = arith.constant dense<0.000000e+00> : vector<8x16xf32>
    %169 = tpu.matmul %167, %168, %cst_97 {dimension_numbers = #tpu.dot_dimension_numbers<[1], [0], [0], [1], [0, 0, 1, 1], [], []>} : vector<8x16xf32>, vector<16x16xf32>, vector<8x16xf32> -> vector<8x16xf32>
    %170 = arith.addf %166, %169 : vector<8x16xf32>
    %171 = vector.extract_strided_slice %159 {offsets = [24, 0], sizes = [8, 16], strides = [1, 1]} : vector<72x16xf32> to vector<8x16xf32>
    %c560_98 = arith.constant 560 : index
    %c0_99 = arith.constant 0 : index
    %172 = vector.load %arg4[%c560_98, %c0_99] : memref<912x32xf32, #tpu.memory_space<vmem>>, vector<16x16xf32>
    %cst_100 = arith.constant dense<0.000000e+00> : vector<8x16xf32>
    %173 = tpu.matmul %171, %172, %cst_100 {dimension_numbers = #tpu.dot_dimension_numbers<[1], [0], [0], [1], [0, 0, 1, 1], [], []>} : vector<8x16xf32>, vector<16x16xf32>, vector<8x16xf32> -> vector<8x16xf32>
    %174 = arith.addf %170, %173 : vector<8x16xf32>
    %175 = vector.extract_strided_slice %159 {offsets = [32, 0], sizes = [8, 16], strides = [1, 1]} : vector<72x16xf32> to vector<8x16xf32>
    %c576_101 = arith.constant 576 : index
    %c0_102 = arith.constant 0 : index
    %176 = vector.load %arg4[%c576_101, %c0_102] : memref<912x32xf32, #tpu.memory_space<vmem>>, vector<16x16xf32>
    %cst_103 = arith.constant dense<0.000000e+00> : vector<8x16xf32>
    %177 = tpu.matmul %175, %176, %cst_103 {dimension_numbers = #tpu.dot_dimension_numbers<[1], [0], [0], [1], [0, 0, 1, 1], [], []>} : vector<8x16xf32>, vector<16x16xf32>, vector<8x16xf32> -> vector<8x16xf32>
    %178 = arith.addf %174, %177 : vector<8x16xf32>
    %179 = vector.extract_strided_slice %159 {offsets = [40, 0], sizes = [8, 16], strides = [1, 1]} : vector<72x16xf32> to vector<8x16xf32>
    %c592_104 = arith.constant 592 : index
    %c0_105 = arith.constant 0 : index
    %180 = vector.load %arg4[%c592_104, %c0_105] : memref<912x32xf32, #tpu.memory_space<vmem>>, vector<16x16xf32>
    %cst_106 = arith.constant dense<0.000000e+00> : vector<8x16xf32>
    %181 = tpu.matmul %179, %180, %cst_106 {dimension_numbers = #tpu.dot_dimension_numbers<[1], [0], [0], [1], [0, 0, 1, 1], [], []>} : vector<8x16xf32>, vector<16x16xf32>, vector<8x16xf32> -> vector<8x16xf32>
    %182 = arith.addf %178, %181 : vector<8x16xf32>
    %183 = vector.extract_strided_slice %159 {offsets = [48, 0], sizes = [8, 16], strides = [1, 1]} : vector<72x16xf32> to vector<8x16xf32>
    %c608_107 = arith.constant 608 : index
    %c0_108 = arith.constant 0 : index
    %184 = vector.load %arg4[%c608_107, %c0_108] : memref<912x32xf32, #tpu.memory_space<vmem>>, vector<16x16xf32>
    %cst_109 = arith.constant dense<0.000000e+00> : vector<8x16xf32>
    %185 = tpu.matmul %183, %184, %cst_109 {dimension_numbers = #tpu.dot_dimension_numbers<[1], [0], [0], [1], [0, 0, 1, 1], [], []>} : vector<8x16xf32>, vector<16x16xf32>, vector<8x16xf32> -> vector<8x16xf32>
    %186 = arith.addf %182, %185 : vector<8x16xf32>
    %187 = vector.extract_strided_slice %159 {offsets = [56, 0], sizes = [8, 16], strides = [1, 1]} : vector<72x16xf32> to vector<8x16xf32>
    %c624_110 = arith.constant 624 : index
    %c0_111 = arith.constant 0 : index
    %188 = vector.load %arg4[%c624_110, %c0_111] : memref<912x32xf32, #tpu.memory_space<vmem>>, vector<16x16xf32>
    %cst_112 = arith.constant dense<0.000000e+00> : vector<8x16xf32>
    %189 = tpu.matmul %187, %188, %cst_112 {dimension_numbers = #tpu.dot_dimension_numbers<[1], [0], [0], [1], [0, 0, 1, 1], [], []>} : vector<8x16xf32>, vector<16x16xf32>, vector<8x16xf32> -> vector<8x16xf32>
    %190 = arith.addf %186, %189 : vector<8x16xf32>
    %191 = vector.extract_strided_slice %159 {offsets = [64, 0], sizes = [8, 16], strides = [1, 1]} : vector<72x16xf32> to vector<8x16xf32>
    %c640 = arith.constant 640 : index
    %c0_113 = arith.constant 0 : index
    %192 = vector.load %arg4[%c640, %c0_113] : memref<912x32xf32, #tpu.memory_space<vmem>>, vector<16x16xf32>
    %cst_114 = arith.constant dense<0.000000e+00> : vector<8x16xf32>
    %193 = tpu.matmul %191, %192, %cst_114 {dimension_numbers = #tpu.dot_dimension_numbers<[1], [0], [0], [1], [0, 0, 1, 1], [], []>} : vector<8x16xf32>, vector<16x16xf32>, vector<8x16xf32> -> vector<8x16xf32>
    %194 = arith.addf %190, %193 : vector<8x16xf32>
    %c0_115 = arith.constant 0 : index
    %c5 = arith.constant 5 : index
    %195 = vector.load %arg3[%c0_115, %c5] : memref<32x14xf32, #tpu.memory_space<vmem>>, vector<8x1xf32>
    %196 = vector.broadcast %195 : vector<8x1xf32> to vector<8x16xf32>
    %197 = arith.addf %194, %196 : vector<8x16xf32>
    %cst_116 = arith.constant 0.000000e+00 : f32
    %198 = vector.broadcast %cst_116 : f32 to vector<8x16xf32>
    %199 = arith.cmpf ogt, %197, %198 : vector<8x16xf32>
    %200 = math.exp %197 : vector<8x16xf32>
    %cst_117 = arith.constant 1.000000e+00 : f32
    %201 = vector.broadcast %cst_117 : f32 to vector<8x16xf32>
    %202 = arith.subf %200, %201 : vector<8x16xf32>
    %203 = arith.select %199, %197, %202 : vector<8x16xi1>, vector<8x16xf32>
    %c328 = arith.constant 328 : index
    %c0_118 = arith.constant 0 : index
    %204 = vector.load %arg2[%c328, %c0_118] : memref<584x32xf32, #tpu.memory_space<vmem>>, vector<72x8xf32>
    %cst_119 = arith.constant dense<0.000000e+00> : vector<72x16xf32>
    %205 = tpu.matmul %204, %203, %cst_119 {dimension_numbers = #tpu.dot_dimension_numbers<[1], [0], [0], [1], [0, 0, 1, 1], [], []>} : vector<72x8xf32>, vector<8x16xf32>, vector<72x16xf32> -> vector<72x16xf32>
    %206 = vector.extract_strided_slice %205 {offsets = [0, 0], sizes = [8, 16], strides = [1, 1]} : vector<72x16xf32> to vector<8x16xf32>
    %c656 = arith.constant 656 : index
    %c0_120 = arith.constant 0 : index
    %207 = vector.load %arg4[%c656, %c0_120] : memref<912x32xf32, #tpu.memory_space<vmem>>, vector<16x8xf32>
    %cst_121 = arith.constant dense<0.000000e+00> : vector<8x8xf32>
    %208 = tpu.matmul %206, %207, %cst_121 {dimension_numbers = #tpu.dot_dimension_numbers<[1], [0], [0], [1], [0, 0, 1, 1], [], []>} : vector<8x16xf32>, vector<16x8xf32>, vector<8x8xf32> -> vector<8x8xf32>
    %209 = vector.extract_strided_slice %205 {offsets = [8, 0], sizes = [8, 16], strides = [1, 1]} : vector<72x16xf32> to vector<8x16xf32>
    %c672_122 = arith.constant 672 : index
    %c0_123 = arith.constant 0 : index
    %210 = vector.load %arg4[%c672_122, %c0_123] : memref<912x32xf32, #tpu.memory_space<vmem>>, vector<16x8xf32>
    %cst_124 = arith.constant dense<0.000000e+00> : vector<8x8xf32>
    %211 = tpu.matmul %209, %210, %cst_124 {dimension_numbers = #tpu.dot_dimension_numbers<[1], [0], [0], [1], [0, 0, 1, 1], [], []>} : vector<8x16xf32>, vector<16x8xf32>, vector<8x8xf32> -> vector<8x8xf32>
    %212 = arith.addf %208, %211 : vector<8x8xf32>
    %213 = vector.extract_strided_slice %205 {offsets = [16, 0], sizes = [8, 16], strides = [1, 1]} : vector<72x16xf32> to vector<8x16xf32>
    %c688_125 = arith.constant 688 : index
    %c0_126 = arith.constant 0 : index
    %214 = vector.load %arg4[%c688_125, %c0_126] : memref<912x32xf32, #tpu.memory_space<vmem>>, vector<16x8xf32>
    %cst_127 = arith.constant dense<0.000000e+00> : vector<8x8xf32>
    %215 = tpu.matmul %213, %214, %cst_127 {dimension_numbers = #tpu.dot_dimension_numbers<[1], [0], [0], [1], [0, 0, 1, 1], [], []>} : vector<8x16xf32>, vector<16x8xf32>, vector<8x8xf32> -> vector<8x8xf32>
    %216 = arith.addf %212, %215 : vector<8x8xf32>
    %217 = vector.extract_strided_slice %205 {offsets = [24, 0], sizes = [8, 16], strides = [1, 1]} : vector<72x16xf32> to vector<8x16xf32>
    %c704_128 = arith.constant 704 : index
    %c0_129 = arith.constant 0 : index
    %218 = vector.load %arg4[%c704_128, %c0_129] : memref<912x32xf32, #tpu.memory_space<vmem>>, vector<16x8xf32>
    %cst_130 = arith.constant dense<0.000000e+00> : vector<8x8xf32>
    %219 = tpu.matmul %217, %218, %cst_130 {dimension_numbers = #tpu.dot_dimension_numbers<[1], [0], [0], [1], [0, 0, 1, 1], [], []>} : vector<8x16xf32>, vector<16x8xf32>, vector<8x8xf32> -> vector<8x8xf32>
    %220 = arith.addf %216, %219 : vector<8x8xf32>
    %221 = vector.extract_strided_slice %205 {offsets = [32, 0], sizes = [8, 16], strides = [1, 1]} : vector<72x16xf32> to vector<8x16xf32>
    %c720_131 = arith.constant 720 : index
    %c0_132 = arith.constant 0 : index
    %222 = vector.load %arg4[%c720_131, %c0_132] : memref<912x32xf32, #tpu.memory_space<vmem>>, vector<16x8xf32>
    %cst_133 = arith.constant dense<0.000000e+00> : vector<8x8xf32>
    %223 = tpu.matmul %221, %222, %cst_133 {dimension_numbers = #tpu.dot_dimension_numbers<[1], [0], [0], [1], [0, 0, 1, 1], [], []>} : vector<8x16xf32>, vector<16x8xf32>, vector<8x8xf32> -> vector<8x8xf32>
    %224 = arith.addf %220, %223 : vector<8x8xf32>
    %225 = vector.extract_strided_slice %205 {offsets = [40, 0], sizes = [8, 16], strides = [1, 1]} : vector<72x16xf32> to vector<8x16xf32>
    %c736_134 = arith.constant 736 : index
    %c0_135 = arith.constant 0 : index
    %226 = vector.load %arg4[%c736_134, %c0_135] : memref<912x32xf32, #tpu.memory_space<vmem>>, vector<16x8xf32>
    %cst_136 = arith.constant dense<0.000000e+00> : vector<8x8xf32>
    %227 = tpu.matmul %225, %226, %cst_136 {dimension_numbers = #tpu.dot_dimension_numbers<[1], [0], [0], [1], [0, 0, 1, 1], [], []>} : vector<8x16xf32>, vector<16x8xf32>, vector<8x8xf32> -> vector<8x8xf32>
    %228 = arith.addf %224, %227 : vector<8x8xf32>
    %229 = vector.extract_strided_slice %205 {offsets = [48, 0], sizes = [8, 16], strides = [1, 1]} : vector<72x16xf32> to vector<8x16xf32>
    %c752_137 = arith.constant 752 : index
    %c0_138 = arith.constant 0 : index
    %230 = vector.load %arg4[%c752_137, %c0_138] : memref<912x32xf32, #tpu.memory_space<vmem>>, vector<16x8xf32>
    %cst_139 = arith.constant dense<0.000000e+00> : vector<8x8xf32>
    %231 = tpu.matmul %229, %230, %cst_139 {dimension_numbers = #tpu.dot_dimension_numbers<[1], [0], [0], [1], [0, 0, 1, 1], [], []>} : vector<8x16xf32>, vector<16x8xf32>, vector<8x8xf32> -> vector<8x8xf32>
    %232 = arith.addf %228, %231 : vector<8x8xf32>
    %233 = vector.extract_strided_slice %205 {offsets = [56, 0], sizes = [8, 16], strides = [1, 1]} : vector<72x16xf32> to vector<8x16xf32>
    %c768_140 = arith.constant 768 : index
    %c0_141 = arith.constant 0 : index
    %234 = vector.load %arg4[%c768_140, %c0_141] : memref<912x32xf32, #tpu.memory_space<vmem>>, vector<16x8xf32>
    %cst_142 = arith.constant dense<0.000000e+00> : vector<8x8xf32>
    %235 = tpu.matmul %233, %234, %cst_142 {dimension_numbers = #tpu.dot_dimension_numbers<[1], [0], [0], [1], [0, 0, 1, 1], [], []>} : vector<8x16xf32>, vector<16x8xf32>, vector<8x8xf32> -> vector<8x8xf32>
    %236 = arith.addf %232, %235 : vector<8x8xf32>
    %237 = vector.extract_strided_slice %205 {offsets = [64, 0], sizes = [8, 16], strides = [1, 1]} : vector<72x16xf32> to vector<8x16xf32>
    %c784 = arith.constant 784 : index
    %c0_143 = arith.constant 0 : index
    %238 = vector.load %arg4[%c784, %c0_143] : memref<912x32xf32, #tpu.memory_space<vmem>>, vector<16x8xf32>
    %cst_144 = arith.constant dense<0.000000e+00> : vector<8x8xf32>
    %239 = tpu.matmul %237, %238, %cst_144 {dimension_numbers = #tpu.dot_dimension_numbers<[1], [0], [0], [1], [0, 0, 1, 1], [], []>} : vector<8x16xf32>, vector<16x8xf32>, vector<8x8xf32> -> vector<8x8xf32>
    %240 = arith.addf %236, %239 : vector<8x8xf32>
    %c0_145 = arith.constant 0 : index
    %c6 = arith.constant 6 : index
    %241 = vector.load %arg3[%c0_145, %c6] : memref<32x14xf32, #tpu.memory_space<vmem>>, vector<8x1xf32>
    %242 = vector.broadcast %241 : vector<8x1xf32> to vector<8x8xf32>
    %243 = arith.addf %240, %242 : vector<8x8xf32>
    %c8 = arith.constant 8 : index
    %c0_146 = arith.constant 0 : index
    %244 = vector.load %arg6[%c8, %c0_146] : memref<32x8xf32, #tpu.memory_space<vmem>>, vector<8x8xf32>
    tpu.vector_store %arg6[%c8, %c0_146], %243 {strides = array<i32>} : memref<32x8xf32, #tpu.memory_space<vmem>>, vector<8x8xf32>,
    %c400 = arith.constant 400 : index
    %c0_147 = arith.constant 0 : index
    %245 = vector.load %arg2[%c400, %c0_147] : memref<584x32xf32, #tpu.memory_space<vmem>>, vector<8x8xf32>
    %c872 = arith.constant 872 : index
    %c0_148 = arith.constant 0 : index
    %246 = vector.load %arg4[%c872, %c0_148] : memref<912x32xf32, #tpu.memory_space<vmem>>, vector<16x8xf32>
    %cst_149 = arith.constant dense<0.000000e+00> : vector<8x8xf32>
    %247 = tpu.matmul %76, %246, %cst_149 {dimension_numbers = #tpu.dot_dimension_numbers<[1], [0], [0], [1], [0, 0, 1, 1], [], []>} : vector<8x16xf32>, vector<16x8xf32>, vector<8x8xf32> -> vector<8x8xf32>
    %cst_150 = arith.constant dense<0.000000e+00> : vector<8x8xf32>
    %248 = tpu.matmul %245, %247, %cst_150 {dimension_numbers = #tpu.dot_dimension_numbers<[1], [0], [0], [1], [0, 0, 1, 1], [], []>} : vector<8x8xf32>, vector<8x8xf32>, vector<8x8xf32> -> vector<8x8xf32>
    %c0_151 = arith.constant 0 : index
    %c7 = arith.constant 7 : index
    %249 = vector.load %arg3[%c0_151, %c7] : memref<32x14xf32, #tpu.memory_space<vmem>>, vector<8x1xf32>
    %250 = vector.broadcast %249 : vector<8x1xf32> to vector<8x8xf32>
    %251 = arith.addf %248, %250 : vector<8x8xf32>
    %c16 = arith.constant 16 : index
    %c0_152 = arith.constant 0 : index
    %252 = vector.load %arg6[%c16, %c0_152] : memref<32x8xf32, #tpu.memory_space<vmem>>, vector<8x8xf32>
    tpu.vector_store %arg6[%c16, %c0_152], %251 {strides = array<i32>} : memref<32x8xf32, #tpu.memory_space<vmem>>, vector<8x8xf32>,
    %c408 = arith.constant 408 : index
    %c0_153 = arith.constant 0 : index
    %253 = vector.load %arg2[%c408, %c0_153] : memref<584x32xf32, #tpu.memory_space<vmem>>, vector<8x8xf32>
    %c888 = arith.constant 888 : index
    %c0_154 = arith.constant 0 : index
    %254 = vector.load %arg4[%c888, %c0_154] : memref<912x32xf32, #tpu.memory_space<vmem>>, vector<16x8xf32>
    %cst_155 = arith.constant dense<0.000000e+00> : vector<8x8xf32>
    %255 = tpu.matmul %76, %254, %cst_155 {dimension_numbers = #tpu.dot_dimension_numbers<[1], [0], [0], [1], [0, 0, 1, 1], [], []>} : vector<8x16xf32>, vector<16x8xf32>, vector<8x8xf32> -> vector<8x8xf32>
    %cst_156 = arith.constant dense<0.000000e+00> : vector<8x8xf32>
    %256 = tpu.matmul %253, %255, %cst_156 {dimension_numbers = #tpu.dot_dimension_numbers<[1], [0], [0], [1], [0, 0, 1, 1], [], []>} : vector<8x8xf32>, vector<8x8xf32>, vector<8x8xf32> -> vector<8x8xf32>
    %c0_157 = arith.constant 0 : index
    %c8_158 = arith.constant 8 : index
    %257 = vector.load %arg3[%c0_157, %c8_158] : memref<32x14xf32, #tpu.memory_space<vmem>>, vector<8x1xf32>
    %258 = vector.broadcast %257 : vector<8x1xf32> to vector<8x8xf32>
    %259 = arith.addf %256, %258 : vector<8x8xf32>
    %c24 = arith.constant 24 : index
    %c0_159 = arith.constant 0 : index
    %260 = vector.load %arg6[%c24, %c0_159] : memref<32x8xf32, #tpu.memory_space<vmem>>, vector<8x8xf32>
    tpu.vector_store %arg6[%c24, %c0_159], %259 {strides = array<i32>} : memref<32x8xf32, #tpu.memory_space<vmem>>, vector<8x8xf32>,
    %c0_160 = arith.constant 0 : index
    %c0_161 = arith.constant 0 : index
    %261 = vector.load %arg6[%c0_160, %c0_161] : memref<32x8xf32, #tpu.memory_space<vmem>>, vector<32x8xf32>
    %c0_162 = arith.constant 0 : index
    %c9 = arith.constant 9 : index
    %262 = vector.load %arg3[%c0_162, %c9] : memref<32x14xf32, #tpu.memory_space<vmem>>, vector<32x1xf32>
    %263 = vector.broadcast %262 : vector<32x1xf32> to vector<32x8xf32>
    %264 = arith.mulf %261, %263 : vector<32x8xf32>
    %c0_163 = arith.constant 0 : index
    %c10 = arith.constant 10 : index
    %265 = vector.load %arg3[%c0_163, %c10] : memref<32x14xf32, #tpu.memory_space<vmem>>, vector<32x1xf32>
    %266 = vector.broadcast %265 : vector<32x1xf32> to vector<32x8xf32>
    %267 = arith.addf %264, %266 : vector<32x8xf32>
    %cst_164 = arith.constant 0.000000e+00 : f32
    %268 = vector.broadcast %cst_164 : f32 to vector<32x8xf32>
    %269 = arith.cmpf ogt, %267, %268 : vector<32x8xf32>
    %270 = math.exp %267 : vector<32x8xf32>
    %cst_165 = arith.constant 1.000000e+00 : f32
    %271 = vector.broadcast %cst_165 : f32 to vector<32x8xf32>
    %272 = arith.subf %270, %271 : vector<32x8xf32>
    %273 = arith.select %269, %267, %272 : vector<32x8xi1>, vector<32x8xf32>
    %c416_166 = arith.constant 416 : index
    %c0_167 = arith.constant 0 : index
    %274 = vector.load %arg2[%c416_166, %c0_167] : memref<584x32xf32, #tpu.memory_space<vmem>>, vector<160x32xf32>
    %cst_168 = arith.constant dense<0.000000e+00> : vector<160x8xf32>
    %275 = tpu.matmul %274, %273, %cst_168 {dimension_numbers = #tpu.dot_dimension_numbers<[1], [0], [0], [1], [0, 0, 1, 1], [], []>} : vector<160x32xf32>, vector<32x8xf32>, vector<160x8xf32> -> vector<160x8xf32>
    %276 = vector.extract_strided_slice %275 {offsets = [0, 0], sizes = [32, 8], strides = [1, 1]} : vector<160x8xf32> to vector<32x8xf32>
    %c800 = arith.constant 800 : index
    %c0_169 = arith.constant 0 : index
    %277 = vector.load %arg4[%c800, %c0_169] : memref<912x32xf32, #tpu.memory_space<vmem>>, vector<8x8xf32>
    %cst_170 = arith.constant dense<0.000000e+00> : vector<32x8xf32>
    %278 = tpu.matmul %276, %277, %cst_170 {dimension_numbers = #tpu.dot_dimension_numbers<[1], [0], [0], [1], [0, 0, 1, 1], [], []>} : vector<32x8xf32>, vector<8x8xf32>, vector<32x8xf32> -> vector<32x8xf32>
    %279 = vector.extract_strided_slice %275 {offsets = [32, 0], sizes = [32, 8], strides = [1, 1]} : vector<160x8xf32> to vector<32x8xf32>
    %c808 = arith.constant 808 : index
    %c0_171 = arith.constant 0 : index
    %280 = vector.load %arg4[%c808, %c0_171] : memref<912x32xf32, #tpu.memory_space<vmem>>, vector<8x8xf32>
    %cst_172 = arith.constant dense<0.000000e+00> : vector<32x8xf32>
    %281 = tpu.matmul %279, %280, %cst_172 {dimension_numbers = #tpu.dot_dimension_numbers<[1], [0], [0], [1], [0, 0, 1, 1], [], []>} : vector<32x8xf32>, vector<8x8xf32>, vector<32x8xf32> -> vector<32x8xf32>
    %282 = arith.addf %278, %281 : vector<32x8xf32>
    %283 = vector.extract_strided_slice %275 {offsets = [64, 0], sizes = [32, 8], strides = [1, 1]} : vector<160x8xf32> to vector<32x8xf32>
    %c816 = arith.constant 816 : index
    %c0_173 = arith.constant 0 : index
    %284 = vector.load %arg4[%c816, %c0_173] : memref<912x32xf32, #tpu.memory_space<vmem>>, vector<8x8xf32>
    %cst_174 = arith.constant dense<0.000000e+00> : vector<32x8xf32>
    %285 = tpu.matmul %283, %284, %cst_174 {dimension_numbers = #tpu.dot_dimension_numbers<[1], [0], [0], [1], [0, 0, 1, 1], [], []>} : vector<32x8xf32>, vector<8x8xf32>, vector<32x8xf32> -> vector<32x8xf32>
    %286 = arith.addf %282, %285 : vector<32x8xf32>
    %287 = vector.extract_strided_slice %275 {offsets = [96, 0], sizes = [32, 8], strides = [1, 1]} : vector<160x8xf32> to vector<32x8xf32>
    %c824 = arith.constant 824 : index
    %c0_175 = arith.constant 0 : index
    %288 = vector.load %arg4[%c824, %c0_175] : memref<912x32xf32, #tpu.memory_space<vmem>>, vector<8x8xf32>
    %cst_176 = arith.constant dense<0.000000e+00> : vector<32x8xf32>
    %289 = tpu.matmul %287, %288, %cst_176 {dimension_numbers = #tpu.dot_dimension_numbers<[1], [0], [0], [1], [0, 0, 1, 1], [], []>} : vector<32x8xf32>, vector<8x8xf32>, vector<32x8xf32> -> vector<32x8xf32>
    %290 = arith.addf %286, %289 : vector<32x8xf32>
    %291 = vector.extract_strided_slice %275 {offsets = [128, 0], sizes = [32, 8], strides = [1, 1]} : vector<160x8xf32> to vector<32x8xf32>
    %c832 = arith.constant 832 : index
    %c0_177 = arith.constant 0 : index
    %292 = vector.load %arg4[%c832, %c0_177] : memref<912x32xf32, #tpu.memory_space<vmem>>, vector<8x8xf32>
    %cst_178 = arith.constant dense<0.000000e+00> : vector<32x8xf32>
    %293 = tpu.matmul %291, %292, %cst_178 {dimension_numbers = #tpu.dot_dimension_numbers<[1], [0], [0], [1], [0, 0, 1, 1], [], []>} : vector<32x8xf32>, vector<8x8xf32>, vector<32x8xf32> -> vector<32x8xf32>
    %294 = arith.addf %290, %293 : vector<32x8xf32>
    %c0_179 = arith.constant 0 : index
    %c11 = arith.constant 11 : index
    %295 = vector.load %arg3[%c0_179, %c11] : memref<32x14xf32, #tpu.memory_space<vmem>>, vector<32x1xf32>
    %296 = vector.broadcast %295 : vector<32x1xf32> to vector<32x8xf32>
    %297 = arith.addf %294, %296 : vector<32x8xf32>
    %c0_180 = arith.constant 0 : index
    %c12 = arith.constant 12 : index
    %298 = vector.load %arg3[%c0_180, %c12] : memref<32x14xf32, #tpu.memory_space<vmem>>, vector<32x1xf32>
    %299 = vector.broadcast %298 : vector<32x1xf32> to vector<32x8xf32>
    %300 = arith.mulf %297, %299 : vector<32x8xf32>
    %c0_181 = arith.constant 0 : index
    %c13 = arith.constant 13 : index
    %301 = vector.load %arg3[%c0_181, %c13] : memref<32x14xf32, #tpu.memory_space<vmem>>, vector<32x1xf32>
    %302 = vector.broadcast %301 : vector<32x1xf32> to vector<32x8xf32>
    %303 = arith.addf %300, %302 : vector<32x8xf32>
    %cst_182 = arith.constant 0.000000e+00 : f32
    %304 = vector.broadcast %cst_182 : f32 to vector<32x8xf32>
    %305 = arith.cmpf ogt, %303, %304 : vector<32x8xf32>
    %306 = math.exp %303 : vector<32x8xf32>
    %cst_183 = arith.constant 1.000000e+00 : f32
    %307 = vector.broadcast %cst_183 : f32 to vector<32x8xf32>
    %308 = arith.subf %306, %307 : vector<32x8xf32>
    %309 = arith.select %305, %303, %308 : vector<32x8xi1>, vector<32x8xf32>
    %c576_184 = arith.constant 576 : index
    %c0_185 = arith.constant 0 : index
    %310 = vector.load %arg2[%c576_184, %c0_185] : memref<584x32xf32, #tpu.memory_space<vmem>>, vector<4x32xf32>
    %c904 = arith.constant 904 : index
    %c0_186 = arith.constant 0 : index
    %311 = vector.load %arg4[%c904, %c0_186] : memref<912x32xf32, #tpu.memory_space<vmem>>, vector<8x2xf32>
    %cst_187 = arith.constant dense<0.000000e+00> : vector<32x2xf32>
    %312 = tpu.matmul %309, %311, %cst_187 {dimension_numbers = #tpu.dot_dimension_numbers<[1], [0], [0], [1], [0, 0, 1, 1], [], []>} : vector<32x8xf32>, vector<8x2xf32>, vector<32x2xf32> -> vector<32x2xf32>
    %cst_188 = arith.constant dense<0.000000e+00> : vector<4x2xf32>
    %313 = tpu.matmul %310, %312, %cst_188 {dimension_numbers = #tpu.dot_dimension_numbers<[1], [0], [0], [1], [0, 0, 1, 1], [], []>} : vector<4x32xf32>, vector<32x2xf32>, vector<4x2xf32> -> vector<4x2xf32>
    %c0_189 = arith.constant 0 : index
    %c0_190 = arith.constant 0 : index
    %314 = vector.load %arg5[%c0_189, %c0_190] : memref<4x2xf32, #tpu.memory_space<vmem>>, vector<4x2xf32>
    tpu.vector_store %arg5[%c0_189, %c0_190], %313 {strides = array<i32>} : memref<4x2xf32, #tpu.memory_space<vmem>>, vector<4x2xf32>,
    return
  }
  func.func @transform_0(%arg0: i32) -> (i32, i32) {
    %c0_i32 = arith.constant 0 : i32
    %c0_i32_0 = arith.constant 0 : i32
    return %c0_i32, %arg0 : i32, i32
  }
  func.func @transform_1(%arg0: i32) -> (i32, i32) {
    %c0_i32 = arith.constant 0 : i32
    %c0_i32_0 = arith.constant 0 : i32
    %c0_i32_1 = arith.constant 0 : i32
    return %c0_i32, %c0_i32_0 : i32, i32
  }
  func.func @transform_2(%arg0: i32) -> (i32, i32) {
    %c0_i32 = arith.constant 0 : i32
    %c0_i32_0 = arith.constant 0 : i32
    %c0_i32_1 = arith.constant 0 : i32
    return %c0_i32, %c0_i32_0 : i32, i32
  }
  func.func @transform_3(%arg0: i32) -> (i32, i32) {
    %c0_i32 = arith.constant 0 : i32
    %c0_i32_0 = arith.constant 0 : i32
    %c0_i32_1 = arith.constant 0 : i32
    return %c0_i32, %c0_i32_0 : i32, i32
  }
  func.func @transform_4(%arg0: i32) -> (i32, i32) {
    %c0_i32 = arith.constant 0 : i32
    %c0_i32_0 = arith.constant 0 : i32
    return %c0_i32, %arg0 : i32, i32
  }
}

</mosaic_0001>

<bundles_post_ra>
// kernel: tpu_custom_call.1
= control target key start
LH: loop header
LB: loop body
LE: loop exit
PB: predicated region body
PF: predicated region fallthrough
CT: control target
= control target key end

     0   :  { %vm83_vm0 = vcmask 1043456   ;;  %vm34_vm1 = vcmask 31744   ;;  %vm160_vm2 = vcmask 261120   ;;  %vm643_vm4 = vcmask 64512   ;;  %s3695_s0 = inlined_call_operand.vmem [shape: f32[4,32], index: 0, kind: input, shape index: {}]   ;;  %s3696_s1 = inlined_call_operand.vmem [shape: f32[584,32], index: 1, kind: input, shape index: {}]   ;;  %s3697_s3 = inlined_call_operand.vmem [shape: f32[912,32], index: 3, kind: input, shape index: {}]   ;;  %s3698_s2 = inlined_call_operand.vmem [shape: f32[32,14], index: 2, kind: input, shape index: {}]   ;;  %s3699_s4 = inlined_call_operand.vmem [shape: f32[4,2], index: 4, kind: output, shape index: {}]  }
   0x1   :  { %v17_v0 = vld [vmem:[%s3695_s0] sm:$0xf]  ;;  %v19_v2 = vld [vmem:[%s3696_s1 + $0x8] sm:$0xff]  ;;  %v20_v3 = vld [vmem:[%s3696_s1 + $0x10] sm:$0xff]  ;;  %vm737_vm5 = vcmask 130048  }
   0x2   :  { %v18_v1 = vld [vmem:[%s3696_s1] sm:$0xff]  ;;  %2558 = vmatpush.msk.msra.mxu0 %vm83_vm0, %v17_v0  ;;  %v21_v4 = vld [vmem:[%s3696_s1 + $0x18] sm:$0xff]  ;;  %v23_v6 = vld [vmem:[%s3696_s1 + $0x28] sm:$0xff]  ;;  %vm2552_vm0 = vcmask 11264  }
   0x3   :  { %2559 = vmatmul.msk.f32.vlgmr.msra.gmra.mxu0 %vm34_vm1, %v18_v1  ;;  %v22_v5 = vld [vmem:[%s3696_s1 + $0x20] sm:$0xff]  ;;  %v24_v7 = vld [vmem:[%s3696_s1 + $0x30] sm:$0xff]  ;;  %v25_v8 = vld [vmem:[%s3696_s1 + $0x38] sm:$0xff] }
   0x4   :  { %v26_v9 = vld [vmem:[%s3696_s1 + $0x40] sm:$0xff]  ;;  %v27_v10 = vld [vmem:[%s3696_s1 + $0x48] sm:$0xff]  ;;  %v28_v11 = vld [vmem:[%s3696_s1 + $0x50] sm:$0xff] }
   0x5   :  { %v155_v12 = vld [vmem:[%s3697_s3 + $0x18] sm:$0xff]  ;;  %v154_v14 = vld [vmem:[%s3697_s3 + $0x10] sm:$0xff]  ;;  %v153_v15 = vld [vmem:[%s3697_s3 + $0x8] sm:$0xff] }
   0x6   :  { %199 = vmatpush.msra.mxu2 %v155_v12  ;;  %v29_v13 = vld [vmem:[%s3696_s1 + $0x58] sm:$0xff]  ;;  %v152_v16 = vld [vmem:[%s3697_s3] sm:$0xff]  ;;  %v158_v19 = vld [vmem:[%s3697_s3 + $0x30] sm:$0xff] }
   0x7   :  { %v30_v17 = vld [vmem:[%s3696_s1 + $0x60] sm:$0xff]  ;;  %v159_v18 = vld [vmem:[%s3697_s3 + $0x38] sm:$0xff]  ;;  %v157_v20 = vld [vmem:[%s3697_s3 + $0x28] sm:$0xff] }
   0x8   :  { %200 = vmatpush.msra.mxu2 %v154_v14  ;;  %176 = vmatpush.msra.mxu1 %v159_v18  ;;  %v156_v21 = vld [vmem:[%s3697_s3 + $0x20] sm:$0xff]  ;;  %v31_v22 = vld [vmem:[%s3696_s1 + $0x68] sm:$0xff]  ;;  %v210_v23 = vld [vmem:[%s3697_s3 + $0x58] sm:$0xff] }
   0x9   :  { %v209_v24 = vld [vmem:[%s3697_s3 + $0x50] sm:$0xff]  ;;  %226 = vmatpush.msra.mxu3 %v210_v23  ;;  %v208_v25 = vld [vmem:[%s3697_s3 + $0x48] sm:$0xff]  ;;  %v207_v26 = vld [vmem:[%s3697_s3 + $0x40] sm:$0xff] }
   0xa   :  { %201 = vmatpush.msra.mxu2 %v153_v15  ;;  %177 = vmatpush.msra.mxu1 %v158_v19  ;;  %v32_v27 = vld [vmem:[%s3696_s1 + $0x70] sm:$0xff]  ;;  %v238_v28 = vld [vmem:[%s3697_s3 + $0x78] sm:$0xff]  ;;  %v236_v30 = vld [vmem:[%s3697_s3 + $0x68] sm:$0xff] }
   0xb   :  { %2560 = vmatmul.msk.f32.gmra.mxu0 %vm34_vm1, %v19_v2  ;;  %227 = vmatpush.msra.mxu3 %v209_v24  ;;  %v237_v29 = vld [vmem:[%s3697_s3 + $0x70] sm:$0xff]  ;;  %v235_v31 = vld [vmem:[%s3697_s3 + $0x60] sm:$0xff]  ;;  %v33_v32 = vld [vmem:[%s3696_s1 + $0x78] sm:$0xff] }
   0xc   :  { %202 = vmatpush.msra.mxu2 %v152_v16  ;;  %178 = vmatpush.msra.mxu1 %v157_v20  ;;  %v266_v33 = vld [vmem:[%s3697_s3 + $0x98] sm:$0xff]  ;;  %v265_v34 = vld [vmem:[%s3697_s3 + $0x90] sm:$0xff]  ;;  %v264_v35 = vld [vmem:[%s3697_s3 + $0x88] sm:$0xff] }
   0xd   :  { %228 = vmatpush.msra.mxu3 %v208_v25  ;;  %v263_v36 = vld [vmem:[%s3697_s3 + $0x80] sm:$0xff]  ;;  %v294_v38 = vld [vmem:[%s3697_s3 + $0xb8] sm:$0xff]  ;;  %v293_v39 = vld [vmem:[%s3697_s3 + $0xb0] sm:$0xff] }
   0xe   :  { %179 = vmatpush.msra.mxu1 %v156_v21  ;;  %282 = vmatpush.msrb.mxu2 %v266_v33  ;;  %v292_v40 = vld [vmem:[%s3697_s3 + $0xa8] sm:$0xff]  ;;  %v291_v41 = vld [vmem:[%s3697_s3 + $0xa0] sm:$0xff]  ;;  %v322_v43 = vld [vmem:[%s3697_s3 + $0xd8] sm:$0xff] }
   0xf   :  { %229 = vmatpush.msra.mxu3 %v207_v26  ;;  %v321_v44 = vld [vmem:[%s3697_s3 + $0xd0] sm:$0xff]  ;;  %v320_v45 = vld [vmem:[%s3697_s3 + $0xc8] sm:$0xff]  ;;  %v319_v46 = vld [vmem:[%s3697_s3 + $0xc0] sm:$0xff] }
  0x10   :  { %254 = vmatpush.msrb.mxu1 %v238_v28  ;;  %283 = vmatpush.msrb.mxu2 %v265_v34  ;;  %v350_v48 = vld [vmem:[%s3697_s3 + $0xf8] sm:$0xff]  ;;  %v349_v49 = vld [vmem:[%s3697_s3 + $0xf0] sm:$0xff]  ;;  %v348_v50 = vld [vmem:[%s3697_s3 + $0xe8] sm:$0xff] }
  0x11   :  { %310 = vmatpush.msrb.mxu3 %v294_v38  ;;  %v347_v51 = vld [vmem:[%s3697_s3 + $0xe0] sm:$0xff]  ;;  %v378_v53 = vld [vmem:[%s3697_s3 + $0x118] sm:$0xff]  ;;  %v377_v54 = vld [vmem:[%s3697_s3 + $0x110] sm:$0xff] }
  0x12   :  { %255 = vmatpush.msrb.mxu1 %v237_v29  ;;  %284 = vmatpush.msrb.mxu2 %v264_v35  ;;  %v376_v55 = vld [vmem:[%s3697_s3 + $0x108] sm:$0xff]  ;;  %v375_v56 = vld [vmem:[%s3697_s3 + $0x100] sm:$0xff]  ;;  %v406_v58 = vld [vmem:[%s3697_s3 + $0x138] sm:$0xff] }
  0x13   :  { %2561 = vmatmul.msk.f32.gmra.mxu0 %vm34_vm1, %v20_v3  ;;  %311 = vmatpush.msrb.mxu3 %v293_v39  ;;  %v405_v59 = vld [vmem:[%s3697_s3 + $0x130] sm:$0xff]  ;;  %v404_v60 = vld [vmem:[%s3697_s3 + $0x128] sm:$0xff]  ;;  %v403_v61 = vld [vmem:[%s3697_s3 + $0x120] sm:$0xff] }
  0x14   :  { %256 = vmatpush.msrb.mxu1 %v236_v30  ;;  %285 = vmatpush.msrb.mxu2 %v263_v36  ;;  %v434_v63 = vld [vmem:[%s3697_s3 + $0x158] sm:$0xff]  ;;  %v433_v0 = vld [vmem:[%s3697_s3 + $0x150] sm:$0xff]  ;;  %v432_v1 = vld [vmem:[%s3697_s3 + $0x148] sm:$0xff] }
  0x15   :  { %312 = vmatpush.msrb.mxu3 %v292_v40  ;;  %v431_v2 = vld [vmem:[%s3697_s3 + $0x140] sm:$0xff]  ;;  %v518_v14 = vld [vmem:[%s3697_s3 + $0x1b8] sm:$0xff]  ;;  %v517_v15 = vld [vmem:[%s3697_s3 + $0x1b0] sm:$0xff] }
  0x16   :  { %257 = vmatpush.msrb.mxu1 %v235_v31  ;;  %v487_v12 = vld [vmem:[%s3697_s3 + $0x180] sm:$0xff]  ;;  %v516_v16 = vld [vmem:[%s3697_s3 + $0x1a8] sm:$0xff]  ;;  %v546_v19 = vld [vmem:[%s3697_s3 + $0x1d8] sm:$0xff]  ;;  %v2787_v31 = vmov 0  }
  0x17   :  { %313 = vmatpush.msrb.mxu3 %v291_v41  ;;  %v545_v20 = vld [vmem:[%s3697_s3 + $0x1d0] sm:$0xff]  ;;  %v544_v21 = vld [vmem:[%s3697_s3 + $0x1c8] sm:$0xff]  ;;  %v574_v24 = vld [vmem:[%s3697_s3 + $0x1f8] sm:$0xff]  ;;  %2739 = vset.pattern.permute.xlu0 %v2787_v31 }
  0x18   :  { %v573_v25 = vld [vmem:[%s3697_s3 + $0x1f0] sm:$0xff]  ;;  %v572_v26 = vld [vmem:[%s3697_s3 + $0x1e8] sm:$0xff]  ;;  %v3101_v30 = vld [vmem:[%s3698_s2] sm:$0xff] }
  0x19   :  { %602 = vperm.xlu0 %2739, %v3101_v30   ;;  %v3180_v31 = vld [vmem:[%s3697_s3 + $0x248] sm:$0xff] }
  0x1b   :  { %2562 = vmatmul.msk.f32.gmra.mxu0 %vm34_vm1, %v21_v4  ;;  %v462_v4 = vld [vmem:[%s3697_s3 + $0x178] sm:$0xff] }
  0x23   :  { %2563 = vmatmul.msk.f32.gmra.mxu0 %vm34_vm1, %v22_v5  ;;  %v461_v5 = vld [vmem:[%s3697_s3 + $0x170] sm:$0xff] }
  0x2b   :  { %2564 = vmatmul.msk.f32.gmra.mxu0 %vm34_vm1, %v23_v6  ;;  %v460_v6 = vld [vmem:[%s3697_s3 + $0x168] sm:$0xff] }
  0x33   :  { %2565 = vmatmul.msk.f32.gmra.mxu0 %vm34_vm1, %v24_v7  ;;  %v459_v7 = vld [vmem:[%s3697_s3 + $0x160] sm:$0xff] }
  0x3b   :  { %2566 = vmatmul.msk.f32.gmra.mxu0 %vm34_vm1, %v25_v8 }
  0x43   :  { %2567 = vmatmul.msk.f32.gmra.mxu0 %vm34_vm1, %v26_v9  ;;  %v490_v9 = vld [vmem:[%s3697_s3 + $0x198] sm:$0xff] }
  0x4b   :  { %2568 = vmatmul.msk.f32.gmra.mxu0 %vm34_vm1, %v27_v10  ;;  %v489_v10 = vld [vmem:[%s3697_s3 + $0x190] sm:$0xff] }
  0x53   :  { %2569 = vmatmul.msk.f32.gmra.mxu0 %vm34_vm1, %v28_v11  ;;  %v488_v11 = vld [vmem:[%s3697_s3 + $0x188] sm:$0xff] }
  0x5b   :  { %2570 = vmatmul.msk.f32.gmra.mxu0 %vm34_vm1, %v29_v13 }
  0x63   :  { %2571 = vmatmul.msk.f32.gmra.mxu0 %vm34_vm1, %v30_v17  ;;  %v515_v17 = vld [vmem:[%s3697_s3 + $0x1a0] sm:$0xff] }
  0x6b   :  { %2572 = vmatmul.msk.f32.gmra.mxu0 %vm34_vm1, %v31_v22  ;;  %v543_v22 = vld [vmem:[%s3697_s3 + $0x1c0] sm:$0xff] }
  0x73   :  { %2573 = vmatmul.msk.f32.gmra.mxu0 %vm34_vm1, %v32_v27  ;;  %v571_v27 = vld [vmem:[%s3697_s3 + $0x1e0] sm:$0xff] }
  0x7b   :  { %2574 = vmatmul.msk.f32.gmra.mxu0 %vm34_vm1, %v33_v32 }
  0x80   :  { %v104_v37 = vpop.f32.mrf.mxu0 }
  0x81   :  { %2576 = vmatmul.msk.f32.vlgmr.msra.gmra.mxu2 %vm160_vm2, %v104_v37 }
  0x82   :  { %366 = vmatpush.msra.mxu2 %v350_v48 }
  0x84   :  { %367 = vmatpush.msra.mxu2 %v349_v49 }
  0x86   :  { %368 = vmatpush.msra.mxu2 %v348_v50  ;;  %v613_v50 = vld [vmem:[%s3697_s3 + $0x358] sm:$0xff] }
  0x88   :  { %v107_v42 = vpop.f32.mrf.mxu0  ;;  %369 = vmatpush.msra.mxu2 %v347_v51 }
  0x89   :  { %2575 = vmatmul.msk.f32.vlgmr.msra.gmra.mxu1 %vm160_vm2, %v107_v42 }
  0x8a   :  { %338 = vmatpush.msra.mxu1 %v322_v43 }
  0x8c   :  { %339 = vmatpush.msra.mxu1 %v321_v44 }
  0x8e   :  { %340 = vmatpush.msra.mxu1 %v320_v45 }
  0x90   :  { %v110_v47 = vpop.f32.mrf.mxu0  ;;  %341 = vmatpush.msra.mxu1 %v319_v46 }
  0x91   :  { %2577 = vmatmul.msk.f32.vlgmr.msra.gmra.mxu3 %vm160_vm2, %v110_v47  ;;  %v614_v47 = vld [vmem:[%s3697_s3 + $0x360] sm:$0xff] }
  0x92   :  { %394 = vmatpush.msra.mxu3 %v378_v53  ;;  %v612_v53 = vld [vmem:[%s3697_s3 + $0x350] sm:$0xff] }
  0x94   :  { %395 = vmatpush.msra.mxu3 %v377_v54 }
  0x96   :  { %396 = vmatpush.msra.mxu3 %v376_v55  ;;  %v611_v55 = vld [vmem:[%s3697_s3 + $0x348] sm:$0xff] }
  0x98   :  { %v113_v52 = vpop.f32.mrf.mxu0  ;;  %397 = vmatpush.msra.mxu3 %v375_v56 }
  0x99   :  { %2578 = vmatmul.msk.f32.vlgmr.msrb.gmra.mxu1 %vm160_vm2, %v113_v52 }
  0x9a   :  { %422 = vmatpush.msrb.mxu1 %v406_v58 }
  0x9c   :  { %423 = vmatpush.msrb.mxu1 %v405_v59 }
  0x9e   :  { %424 = vmatpush.msrb.mxu1 %v404_v60 }
  0xa0   :  { %v116_v57 = vpop.f32.mrf.mxu0  ;;  %425 = vmatpush.msrb.mxu1 %v403_v61 }
  0xa1   :  { %2579 = vmatmul.msk.f32.vlgmr.msrb.gmra.mxu2 %vm160_vm2, %v116_v57 }
  0xa2   :  { %450 = vmatpush.msrb.mxu2 %v434_v63 }
  0xa4   :  { %451 = vmatpush.msrb.mxu2 %v433_v0 }
  0xa6   :  { %452 = vmatpush.msrb.mxu2 %v432_v1 }
  0xa8   :  { %v119_v62 = vpop.f32.mrf.mxu0  ;;  %453 = vmatpush.msrb.mxu2 %v431_v2 }
  0xa9   :  { %2580 = vmatmul.msk.f32.vlgmr.msrb.gmra.mxu3 %vm160_vm2, %v119_v62 }
  0xaa   :  { %478 = vmatpush.msrb.mxu3 %v462_v4 }
  0xac   :  { %479 = vmatpush.msrb.mxu3 %v461_v5  ;;  %v603_v5 = vpop.permute.xlu0 %602 }
  0xae   :  { %480 = vmatpush.msrb.mxu3 %v460_v6 }
  0xb0   :  { %v122_v3 = vpop.f32.mrf.mxu0  ;;  %481 = vmatpush.msrb.mxu3 %v459_v7 }
  0xb1   :  { %2581 = vmatmul.msk.f32.vlgmr.msra.gmra.mxu1 %vm160_vm2, %v122_v3 }
  0xb2   :  { %506 = vmatpush.msra.mxu1 %v490_v9 }
  0xb4   :  { %507 = vmatpush.msra.mxu1 %v489_v10 }
  0xb6   :  { %508 = vmatpush.msra.mxu1 %v488_v11 }
  0xb8   :  { %v125_v8 = vpop.f32.mrf.mxu0  ;;  %509 = vmatpush.msra.mxu1 %v487_v12  ;;  %v2788_v12 = vmov 1  }
  0xb9   :  { %2582 = vmatmul.msk.f32.vlgmr.msra.gmra.mxu2 %vm160_vm2, %v125_v8  ;;  %2740 = vset.pattern.permute.xlu0 %v2788_v12  ;;  %v3275_v12 = vld [vmem:[%s3697_s3 + $0x2a8] sm:$0xff] }
  0xba   :  { %534 = vmatpush.msra.mxu2 %v518_v14  ;;  %640 = vperm.xlu0 %2740, %v3101_v30  }
  0xbc   :  { %535 = vmatpush.msra.mxu2 %v517_v15 }
  0xbe   :  { %536 = vmatpush.msra.mxu2 %v516_v16 }
  0xc0   :  { %v128_v13 = vpop.f32.mrf.mxu0  ;;  %537 = vmatpush.msra.mxu2 %v515_v17 }
  0xc1   :  { %2583 = vmatmul.msk.f32.vlgmr.msra.gmra.mxu3 %vm160_vm2, %v128_v13  ;;  %v638_v13 = vld [vmem:[%s3696_s1 + $0x80] sm:$0xff] }
  0xc2   :  { %562 = vmatpush.msra.mxu3 %v546_v19  ;;  %v668_v19 = vld [vmem:[%s3696_s1 + $0x98] sm:$0xff] }
  0xc4   :  { %563 = vmatpush.msra.mxu3 %v545_v20  ;;  %v669_v20 = vld [vmem:[%s3696_s1 + $0xa0] sm:$0xff] }
  0xc6   :  { %564 = vmatpush.msra.mxu3 %v544_v21  ;;  %v667_v21 = vld [vmem:[%s3696_s1 + $0x90] sm:$0xff] }
  0xc8   :  { %v131_v18 = vpop.f32.mrf.mxu0  ;;  %565 = vmatpush.msra.mxu3 %v543_v22  ;;  %v3143_v22 = vld [vmem:[%s3697_s3 + $0x228] sm:$0xff] }
  0xc9   :  { %2584 = vmatmul.msk.f32.vlgmr.msrb.gmra.mxu1 %vm160_vm2, %v131_v18  ;;  %v670_v18 = vld [vmem:[%s3696_s1 + $0xa8] sm:$0xff] }
  0xca   :  { %590 = vmatpush.msrb.mxu1 %v574_v24  ;;  %v672_v24 = vld [vmem:[%s3696_s1 + $0xb8] sm:$0xff] }
  0xcc   :  { %591 = vmatpush.msrb.mxu1 %v573_v25  ;;  %v673_v25 = vld [vmem:[%s3696_s1 + $0xc0] sm:$0xff] }
  0xce   :  { %592 = vmatpush.msrb.mxu1 %v572_v26  ;;  %v734_v26 = vld [vmem:[%s3697_s3 + $0x218] sm:$0xff] }
  0xd0   :  { %v134_v23 = vpop.f32.mrf.mxu0  ;;  %593 = vmatpush.msrb.mxu1 %v571_v27  ;;  %v3168_v27 = vld [vmem:[%s3697_s3 + $0x220] sm:$0xff] }
  0xd1   :  { %2585 = vmatmul.msk.f32.vlgmr.msrb.gmra.mxu2 %vm160_vm2, %v134_v23  ;;  %v671_v23 = vld [vmem:[%s3696_s1 + $0xb0] sm:$0xff] }
  0xd2   :  { %630 = vmatpush.msrb.mxu2 %v614_v47 }
  0xd4   :  { %631 = vmatpush.msrb.mxu2 %v613_v50 }
  0xd6   :  { %632 = vmatpush.msrb.mxu2 %v612_v53 }
  0xd8   :  { %v137_v28 = vpop.f32.mrf.mxu0  ;;  %633 = vmatpush.msrb.mxu2 %v611_v55 }
  0xd9   :  { %2586 = vmatmul.msk.f32.vlgmr.msrb.gmra.mxu3 %vm160_vm2, %v137_v28  ;;  %v733_v28 = vld [vmem:[%s3697_s3 + $0x210] sm:$0xff] }
  0xe0   :  { %v140_v29 = vpop.f32.mrf.mxu0 }
  0xe1   :  { %2587 = vmatmul.msk.f32.vlgmr.msra.gmra.mxu1 %vm160_vm2, %v140_v29  ;;  %v785_v29 = vld [vmem:[%s3697_s3 + $0x238] sm:$0xff] }
  0xe8   :  { %v143_v32 = vpop.f32.mrf.mxu0 }
  0xe9   :  { %2588 = vmatmul.msk.f32.vlgmr.msra.gmra.mxu2 %vm160_vm2, %v143_v32  ;;  %v784_v32 = vld [vmem:[%s3697_s3 + $0x230] sm:$0xff] }
  0xf0   :  { %v146_v33 = vpop.f32.mrf.mxu0 }
  0xf1   :  { %2589 = vmatmul.msk.f32.vlgmr.msra.gmra.mxu3 %vm160_vm2, %v146_v33  ;;  %v3189_v33 = vld [vmem:[%s3697_s3 + $0x240] sm:$0xff] }
  0xf8   :  { %v149_v34 = vpop.f32.mrf.mxu0 }
  0xf9   :  { %2590 = vmatmul.msk.f32.vlgmr.msrb.gmra.mxu1 %vm160_vm2, %v149_v34  ;;  %v837_v34 = vld [vmem:[%s3697_s3 + $0x258] sm:$0xff] }
 0x104   :  { %v204_v36 = vpop.f32.mrf.mxu2 }
 0x106   :  { %v181_v35 = vpop.f32.mrf.mxu1 }
 0x107   :  { %v205_v38 = vadd.f32 %v204_v36, %v181_v35  ;;  %v3198_v36 = vld [vmem:[%s3697_s3 + $0x268] sm:$0xff] }
 0x114   :  { %v231_v37 = vpop.f32.mrf.mxu3 }
 0x115   :  { %v234_v39 = vadd.f32 %v231_v37, %v205_v38  ;;  %v2789_v37 = vmov 3  }
 0x116   :  { %v259_v40 = vpop.f32.mrf.mxu1  ;;  %2741 = vset.pattern.permute.xlu1 %v2789_v37  ;;  %v3354_v37 = vld [vmem:[%s3697_s3 + $0x300] sm:$0xff] }
 0x117   :  { %v262_v42 = vadd.f32 %v259_v40, %v234_v39  ;;  %v836_v39 = vld [vmem:[%s3697_s3 + $0x250] sm:$0xff]  ;;  %915 = vperm.xlu1 %2741, %v3101_v30   ;;  %v3209_v40 = vld [vmem:[%s3697_s3 + $0x260] sm:$0xff] }
 0x124   :  { %v287_v41 = vpop.f32.mrf.mxu2 }
 0x125   :  { %v290_v44 = vadd.f32 %v287_v41, %v262_v42 }
 0x12c   :  { %v315_v43 = vpop.f32.mrf.mxu3  ;;  %v641_v15 = vpop.permute.xlu0 %640 }
 0x12d   :  { %v318_v45 = vadd.f32 %v315_v43, %v290_v44  ;;  %v3216_v43 = vld [vmem:[%s3697_s3 + $0x278] sm:$0xff]  ;;  %v3222_v44 = vld [vmem:[%s3697_s3 + $0x270] sm:$0xff] }
 0x12e   :  { %v343_v46 = vpop.f32.mrf.mxu1 }
 0x12f   :  { %v346_v49 = vadd.f32 %v343_v46, %v318_v45 }
 0x13c   :  { %v371_v48 = vpop.f32.mrf.mxu2 }
 0x13d   :  { %v374_v52 = vadd.f32 %v371_v48, %v346_v49 }
 0x144   :  { %v399_v51 = vpop.f32.mrf.mxu3 }
 0x145   :  { %v402_v54 = vadd.f32 %v399_v51, %v374_v52 }
 0x146   :  { %v427_v56 = vpop.f32.mrf.mxu1 }
 0x147   :  { %v430_v58 = vadd.f32 %v427_v56, %v402_v54 }
 0x154   :  { %v455_v57 = vpop.f32.mrf.mxu2 }
 0x155   :  { %v458_v60 = vadd.f32 %v455_v57, %v430_v58 }
 0x15c   :  { %v483_v59 = vpop.f32.mrf.mxu3 }
 0x15d   :  { %v486_v61 = vadd.f32 %v483_v59, %v458_v60 }
 0x15e   :  { %v511_v62 = vpop.f32.mrf.mxu1 }
 0x15f   :  { %v514_v0 = vadd.f32 %v511_v62, %v486_v61 }
 0x16c   :  { %v539_v63 = vpop.f32.mrf.mxu2 }
 0x16d   :  { %v542_v1 = vadd.f32 %v539_v63, %v514_v0 }
 0x174   :  { %v567_v2 = vpop.f32.mrf.mxu3 }
 0x175   :  { %v570_v3 = vadd.f32 %v567_v2, %v542_v1  ;;  %v924_v2 = vld [vmem:[%s3696_s1 + $0xc8] sm:$0xff] }
 0x176   :  { %v595_v4 = vpop.f32.mrf.mxu1 }
 0x177   :  { %v598_v6 = vadd.f32 %v595_v4, %v570_v3  ;;  %v925_v4 = vld [vmem:[%s3696_s1 + $0xd0] sm:$0xff] }
 0x179   :  { %v605_v7 = vadd.f32 %v603_v5, %v598_v6  ;;  %v926_v5 = vld [vmem:[%s3696_s1 + $0xd8] sm:$0xff]  ;;  %v927_v6 = vld [vmem:[%s3696_s1 + $0xe0] sm:$0xff] }
 0x17b   :  { %v607_v8 = vmul.f32 1.442695, %v605_v7  ;;  %vm606_vm3 = vcmp.gt.f32.partialorder %v605_v7, 0.0 }
 0x17d   :  { %2764 = vpow2.f32 %v607_v8  ;;  %v929_v8 = vld [vmem:[%s3696_s1 + $0xf0] sm:$0xff] }
 0x183   :  { %v2765_v9 = vpop.eup %2764 }
 0x184   :  { %v2591_v10 = vadd.f32 -1.0, %v2765_v9  ;;  %v930_v9 = vld [vmem:[%s3696_s1 + $0xf8] sm:$0xff] }
 0x186   :  { %v610_v11 = vsel %vm606_vm3, %v605_v7, %v2591_v10  ;;  %v928_v7 = vld [vmem:[%s3696_s1 + $0xe8] sm:$0xff]  ;;  %v3263_v10 = vld [vmem:[%s3697_s3 + $0x2b8] sm:$0xff] }
 0x187   :  { %2592 = vmatmul.msk.f32.vlgmr.msrb.gmra.mxu2 %vm160_vm2, %v610_v11  ;;  %v3269_v11 = vld [vmem:[%s3697_s3 + $0x2b0] sm:$0xff] }
 0x189   :  { %v916_v60 = vpop.permute.xlu1 %915 }
 0x20a   :  { %v3124_v14 = vpop.f32.mrf.mxu2 }
 0x20b   :  { %662 = vmatpush.msrb.mxu3 %v3124_v14 }
 0x20c   :  { %2593 = vmatmul.msk.f32.vlgmr.msrb.gmra.mxu3 %vm643_vm4, %v638_v13  ;;  %v3281_v13 = vld [vmem:[%s3697_s3 + $0x2d8] sm:$0xff] }
 0x28f   :  { %v664_v16 = vpop.f32.mrf.mxu3 }
 0x290   :  { %v665_v17 = vadd.f32 %v664_v16, %v641_v15  ;;  %v3286_v15 = vld [vmem:[%s3697_s3 + $0x2d0] sm:$0xff]  ;;  %v3292_v16 = vld [vmem:[%s3697_s3 + $0x2f8] sm:$0xff] }
 0x292   :  { %710 = vmatpush.msrb.mxu0 %v665_v17  ;;  %2718 = vmatpush.msra.mxu1 %v665_v17 }
 0x293   :  { %2719 = vmatpush.msra.mxu2 %v665_v17  ;;  %2720 = vmatpush.msra.mxu3 %v665_v17  ;;  %v3297_v17 = vld [vmem:[%s3697_s3 + $0x2a0] sm:$0xff] }
 0x294   :  { %2597 = vmatmul.msk.f32.vlgmr.msra.gmra.mxu3 %vm643_vm4, %v670_v18  ;;  %2595 = vmatmul.msk.f32.vlgmr.msra.gmra.mxu1 %vm643_vm4, %v668_v19  ;;  %v3305_v18 = vld [vmem:[%s3697_s3 + $0x2f0] sm:$0xff] }
 0x295   :  { %2596 = vmatmul.msk.f32.vlgmr.msra.gmra.mxu2 %vm643_vm4, %v669_v20  ;;  %2594 = vmatmul.msk.f32.vlgmr.msrb.gmra.mxu0 %vm643_vm4, %v667_v21  ;;  %v2790_v20 = vmov 2   ;;  %v3312_v21 = vld [vmem:[%s3697_s3 + $0x2c8] sm:$0xff] }
 0x296   :  { %755 = vmatpush.msrb.mxu2 %v3143_v22  ;;  %778 = vmatpush.msrb.mxu3 %v734_v26 }
 0x297   :  { %1307 = vmatpush.msra.mxu0 %v734_v26  ;;  %1085 = vmatpush.msrb.mxu1 %v3281_v13 }
 0x298   :  { %756 = vmatpush.msrb.mxu2 %v3168_v27  ;;  %779 = vmatpush.msrb.mxu3 %v733_v28 }
 0x299   :  { %1308 = vmatpush.msra.mxu0 %v733_v28  ;;  %1086 = vmatpush.msrb.mxu1 %v3286_v15  ;;  %v2792_v28 = vmov 4  }
 0x29a   :  { %803 = vmatpush.msra.mxu2 %v785_v29  ;;  %829 = vmatpush.msra.mxu3 %v3180_v31 }
 0x29b   :  { %1381 = vmatpush.msrb.mxu0 %v785_v29  ;;  %1137 = vmatpush.msra.mxu1 %v3292_v16  ;;  %v3338_v29 = vld [vmem:[%s3698_s2 + $0x18] sm:$0xff] }
 0x29c   :  { %2598 = vmatmul.msk.f32.gmra.mxu3 %vm643_vm4, %v671_v23  ;;  %804 = vmatpush.msra.mxu2 %v784_v32  ;;  %v3318_v23 = vld [vmem:[%s3697_s3 + $0x2c0] sm:$0xff] }
 0x29d   :  { %830 = vmatpush.msra.mxu3 %v3189_v33  ;;  %1382 = vmatpush.msrb.mxu0 %v784_v32  ;;  %v2793_v32 = vmov 9  }
 0x29e   :  { %1138 = vmatpush.msra.mxu1 %v3305_v18  ;;  %2742 = vset.pattern.permute.xlu1 %v2790_v20  ;;  %v1287_v20 = vld [vmem:[%s3697_s3 + $0x208] sm:$0xff] }
 0x29f   :  { %1180 = vperm.xlu1 %2742, %v3101_v30   ;;  %2747 = vset.pattern.permute.xlu0 %v2792_v28 }
 0x2a0   :  { %1171 = vperm.xlu0 %2747, %v3101_v30  }
 0x2a4   :  { %2599 = vmatmul.msk.f32.gmra.mxu3 %vm643_vm4, %v672_v24  ;;  %v2791_v24 = vmov 7  }
 0x2a7   :  { %2745 = vset.pattern.permute.xlu1 %v2791_v24 }
 0x2a8   :  { %1875 = vperm.xlu1 %2745, %v3101_v30  }
 0x2ac   :  { %2600 = vmatmul.msk.f32.gmra.mxu3 %vm643_vm4, %v673_v25  ;;  %v3326_v25 = vld [vmem:[%s3697_s3 + $0x2e8] sm:$0xff] }
 0x2b0   :  { %2748 = vset.pattern.permute.xlu1 %v2793_v32 }
 0x2b1   :  { %1980 = vperm.xlu1 %2748, %v3338_v29  }
 0x311   :  { %v715_v35 = vpop.f32.mrf.mxu1 }
 0x312   :  { %2601 = vmatmul.msk.f32.vlgmr.msrb.gmra.mxu2 %vm737_vm5, %v715_v35  ;;  %v712_v38 = vpop.f32.mrf.mxu0 }
 0x313   :  { %2602 = vmatmul.msk.f32.vlgmr.msrb.gmra.mxu3 %vm737_vm5, %v712_v38  ;;  %855 = vmatpush.msrb.mxu2 %v837_v34  ;;  %v2794_v38 = vmov 10  }
 0x314   :  { %881 = vmatpush.msrb.mxu3 %v3198_v36  ;;  %2751 = vset.pattern.permute.xlu0 %v2794_v38 }
 0x315   :  { %856 = vmatpush.msrb.mxu2 %v836_v39  ;;  %2750 = vset.pattern.permute.xlu1 %v2794_v38 }
 0x316   :  { %882 = vmatpush.msrb.mxu3 %v3209_v40  ;;  %2000 = vperm.xlu1 %2750, %v3338_v29  }
 0x317   :  { %v721_v41 = vpop.f32.mrf.mxu3 }
 0x318   :  { %v718_v42 = vpop.f32.mrf.mxu2 }
 0x31a   :  { %2603 = vmatmul.msk.f32.vlgmr.msra.gmra.mxu2 %vm737_vm5, %v718_v42  ;;  %v1176_v42 = vld [vmem:[%s3696_s1 + $0x88] sm:$0xff] }
 0x31b   :  { %2604 = vmatmul.msk.f32.vlgmr.msra.gmra.mxu3 %vm737_vm5, %v721_v41  ;;  %907 = vmatpush.msra.mxu2 %v3216_v43 }
 0x31d   :  { %908 = vmatpush.msra.mxu2 %v3222_v44 }
 0x31e   :  { %2752 = vset.pattern.permute.xlu1 %v2793_v32 }
 0x31f   :  { %v724_v45 = vpop.f32.mrf.mxu3  ;;  %1965 = vperm.xlu1 %2752, %v3101_v30  }
 0x322   :  { %2605 = vmatmul.msk.f32.vlgmr.msrb.gmra.mxu2 %vm737_vm5, %v724_v45 }
 0x323   :  { %1011 = vmatpush.msrb.mxu2 %v3263_v10 }
 0x325   :  { %1012 = vmatpush.msrb.mxu2 %v3269_v11 }
 0x327   :  { %v727_v46 = vpop.f32.mrf.mxu3  ;;  %2754 = vset.pattern.permute.xlu1 %v2794_v38 }
 0x328   :  { %2606 = vmatmul.msk.f32.vlgmr.msrb.gmra.mxu3 %vm737_vm5, %v727_v46  ;;  %1988 = vperm.xlu1 %2754, %v3101_v30  }
 0x32f   :  { %v730_v47 = vpop.f32.mrf.mxu3 }
 0x330   :  { %2607 = vmatmul.msk.f32.vlgmr.msra.gmra.mxu2 %vm737_vm5, %v730_v47 }
 0x331   :  { %1034 = vmatpush.msra.mxu2 %v3275_v12 }
 0x333   :  { %1035 = vmatpush.msra.mxu2 %v3297_v17 }
 0x395   :  { %v758_v48 = vpop.f32.mrf.mxu2 }
 0x396   :  { %v781_v49 = vpop.f32.mrf.mxu3 }
 0x397   :  { %v782_v51 = vadd.f32 %v781_v49, %v758_v48 }
 0x39d   :  { %v806_v50 = vpop.f32.mrf.mxu2 }
 0x39e   :  { %v832_v52 = vpop.f32.mrf.mxu3  ;;  %v809_v53 = vadd.f32 %v806_v50, %v782_v51 }
 0x3a0   :  { %v835_v55 = vadd.f32 %v832_v52, %v809_v53 }
 0x3a5   :  { %v858_v54 = vpop.f32.mrf.mxu2 }
 0x3a6   :  { %v861_v57 = vadd.f32 %v858_v54, %v835_v55  ;;  %v1181_v55 = vpop.permute.xlu1 %1180 }
 0x3ab   :  { %v884_v56 = vpop.f32.mrf.mxu3 }
 0x3ac   :  { %v887_v58 = vadd.f32 %v884_v56, %v861_v57 }
 0x3b3   :  { %v910_v59 = vpop.f32.mrf.mxu2 }
 0x3b4   :  { %v913_v61 = vadd.f32 %v910_v59, %v887_v58  ;;  %v1206_v58 = vld [vmem:[%s3696_s1 + $0x100] sm:$0xff] }
 0x3b6   :  { %v918_v62 = vadd.f32 %v916_v60, %v913_v61 }
 0x3b8   :  { %v920_v63 = vmul.f32 1.442695, %v918_v62  ;;  %vm919_vm6 = vcmp.gt.f32.partialorder %v918_v62, 0.0 }
 0x3ba   :  { %2766 = vpow2.f32 %v920_v63 }
 0x3c0   :  { %v2767_v0 = vpop.eup %2766 }
 0x3c1   :  { %v2608_v1 = vadd.f32 -1.0, %v2767_v0  ;;  %v1207_v0 = vld [vmem:[%s3696_s1 + $0x108] sm:$0xff] }
 0x3c3   :  { %v923_v3 = vsel %vm919_vm6, %v918_v62, %v2608_v1  ;;  %v1172_v62 = vpop.permute.xlu0 %1171 }
 0x3c4   :  { %967 = vmatpush.msra.mxu3 %v923_v3  ;;  %v1209_v3 = vld [vmem:[%s3696_s1 + $0x118] sm:$0xff] }
 0x3c5   :  { %2609 = vmatmul.msk.f32.vlgmr.msra.gmra.mxu3 %vm643_vm4, %v924_v2  ;;  %v1208_v2 = vld [vmem:[%s3696_s1 + $0x110] sm:$0xff] }
 0x3c6   :  { %1355 = vmatpush.msrb.mxu3 %v3143_v22 }
 0x3c8   :  { %1356 = vmatpush.msrb.mxu3 %v3168_v27  ;;  %v3332_v27 = vld [vmem:[%s3697_s3 + $0x2e0] sm:$0xff] }
 0x3ca   :  { %1433 = vmatpush.msra.mxu3 %v837_v34  ;;  %v3347_v34 = vld [vmem:[%s3697_s3 + $0x308] sm:$0xff] }
 0x3cc   :  { %1434 = vmatpush.msra.mxu3 %v836_v39 }
 0x3cd   :  { %2610 = vmatmul.msk.f32.gmra.mxu3 %vm643_vm4, %v925_v4  ;;  %v1210_v4 = vld [vmem:[%s3696_s1 + $0x120] sm:$0xff] }
 0x3d5   :  { %2611 = vmatmul.msk.f32.gmra.mxu3 %vm643_vm4, %v926_v5  ;;  %v1904_v5 = vld [vmem:[%s3697_s3 + $0x380] sm:$0xff] }
 0x3dd   :  { %2612 = vmatmul.msk.f32.gmra.mxu3 %vm643_vm4, %v927_v6  ;;  %v1903_v6 = vld [vmem:[%s3697_s3 + $0x378] sm:$0xff] }
 0x3e5   :  { %2613 = vmatmul.msk.f32.gmra.mxu3 %vm643_vm4, %v928_v7  ;;  %v1211_v7 = vld [vmem:[%s3696_s1 + $0x128] sm:$0xff] }
 0x3ed   :  { %2614 = vmatmul.msk.f32.gmra.mxu3 %vm643_vm4, %v929_v8  ;;  %v1212_v8 = vld [vmem:[%s3696_s1 + $0x130] sm:$0xff] }
 0x3f5   :  { %2615 = vmatmul.msk.f32.gmra.mxu3 %vm643_vm4, %v930_v9  ;;  %v1213_v9 = vld [vmem:[%s3696_s1 + $0x138] sm:$0xff] }
 0x448   :  { %v969_v19 = vpop.f32.mrf.mxu3 }
 0x450   :  { %v972_v22 = vpop.f32.mrf.mxu3 }
 0x451   :  { %2616 = vmatmul.msk.f32.vlgmr.msrb.gmra.mxu2 %vm737_vm5, %v972_v22  ;;  %v1286_v22 = vld [vmem:[%s3697_s3 + $0x200] sm:$0xff] }
 0x452   :  { %1059 = vmatpush.msrb.mxu2 %v3312_v21 }
 0x454   :  { %1060 = vmatpush.msrb.mxu2 %v3318_v23 }
 0x458   :  { %v975_v26 = vpop.f32.mrf.mxu3 }
 0x459   :  { %2617 = vmatmul.msk.f32.vlgmr.msra.gmra.mxu2 %vm737_vm5, %v969_v19  ;;  %v1214_v19 = vld [vmem:[%s3696_s1 + $0x140] sm:$0xff] }
 0x45a   :  { %1111 = vmatpush.msra.mxu2 %v3326_v25 }
 0x45c   :  { %1112 = vmatpush.msra.mxu2 %v3332_v27 }
 0x460   :  { %v978_v35 = vpop.f32.mrf.mxu3 }
 0x461   :  { %2619 = vmatmul.msk.f32.vlgmr.msrb.gmra.mxu1 %vm737_vm5, %v978_v35  ;;  %2618 = vmatmul.msk.f32.vlgmr.msrb.gmra.mxu2 %vm737_vm5, %v975_v26 }
 0x462   :  { %1201 = vmatpush.msrb.mxu1 %v3124_v14  ;;  %1163 = vmatpush.msrb.mxu2 %v3347_v34 }
 0x464   :  { %1164 = vmatpush.msrb.mxu2 %v3354_v37 }
 0x468   :  { %v981_v39 = vpop.f32.mrf.mxu3 }
 0x469   :  { %2620 = vmatmul.msk.f32.vlgmr.msra.gmra.mxu2 %vm737_vm5, %v981_v39 }
 0x470   :  { %v984_v41 = vpop.f32.mrf.mxu3 }
 0x471   :  { %2621 = vmatmul.msk.f32.vlgmr.msra.gmra.mxu1 %vm737_vm5, %v984_v41 }
 0x472   :  { %1330 = vmatpush.msra.mxu1 %v1287_v20 }
 0x474   :  { %1331 = vmatpush.msra.mxu1 %v1286_v22 }
 0x478   :  { %v987_v45 = vpop.f32.mrf.mxu3 }
 0x479   :  { %2623 = vmatmul.msk.f32.vlgmr.msrb.gmra.mxu1 %vm643_vm4, %v1176_v42  ;;  %2622 = vmatmul.msk.f32.vlgmr.msrb.gmra.mxu2 %vm737_vm5, %v987_v45 }
 0x47a   :  { %1407 = vmatpush.msrb.mxu1 %v3180_v31 }
 0x47c   :  { %1408 = vmatpush.msrb.mxu1 %v3189_v33  ;;  %v1493_v33 = vld [vmem:[%s3697_s3 + $0x288] sm:$0xff] }
 0x4d4   :  { %v1014_v46 = vpop.f32.mrf.mxu2 }
 0x4dc   :  { %v1037_v47 = vpop.f32.mrf.mxu2 }
 0x4dd   :  { %v1038_v51 = vadd.f32 %v1037_v47, %v1014_v46 }
 0x4de   :  { %v1088_v48 = vpop.f32.mrf.mxu1 }
 0x4e4   :  { %v1062_v49 = vpop.f32.mrf.mxu2 }
 0x4e5   :  { %v1065_v52 = vadd.f32 %v1062_v49, %v1038_v51 }
 0x4e7   :  { %v1091_v54 = vadd.f32 %v1088_v48, %v1065_v52 }
 0x4ec   :  { %v1114_v53 = vpop.f32.mrf.mxu2 }
 0x4ed   :  { %v1117_v59 = vadd.f32 %v1114_v53, %v1091_v54 }
 0x4ee   :  { %v1140_v50 = vpop.f32.mrf.mxu1 }
 0x4ef   :  { %v1143_v60 = vadd.f32 %v1140_v50, %v1117_v59 }
 0x4f6   :  { %v1203_v56 = vpop.f32.mrf.mxu1 }
 0x4f7   :  { %v1204_v57 = vadd.f32 %v1203_v56, %v1181_v55 }
 0x4f9   :  { %1257 = vmatpush.msra.mxu2 %v1204_v57 }
 0x4fa   :  { %2624 = vmatmul.msk.f32.vlgmr.msra.gmra.mxu2 %vm643_vm4, %v1206_v58 }
 0x4fb   :  { %1919 = vmatpush.msrb.mxu2 %v1904_v5  ;;  %v1534_v5 = vld [vmem:[%s3696_s1 + $0x178] sm:$0xff] }
 0x4fc   :  { %v1166_v61 = vpop.f32.mrf.mxu2 }
 0x4fd   :  { %v1169_v63 = vadd.f32 %v1166_v61, %v1143_v60  ;;  %1920 = vmatpush.msrb.mxu2 %v1903_v6  ;;  %v1535_v6 = vld [vmem:[%s3696_s1 + $0x180] sm:$0xff] }
 0x4ff   :  { %v1174_v1 = vadd.f32 %v1172_v62, %v1169_v63  ;;  %v1528_v62 = vld [vmem:[%s3696_s1 + $0x148] sm:$0xff] }
 0x501   :  { %1175 = vst.msk [vmem:[#allocation2] sm:$0xff] %vm643_vm4, %v1174_v1  ;;  %v1530_v1 = vld [vmem:[%s3696_s1 + $0x158] sm:$0xff] }
 0x502   :  { %2625 = vmatmul.msk.f32.gmra.mxu2 %vm643_vm4, %v1207_v0  ;;  %v1529_v0 = vld [vmem:[%s3696_s1 + $0x150] sm:$0xff] }
 0x50a   :  { %2626 = vmatmul.msk.f32.gmra.mxu2 %vm643_vm4, %v1208_v2  ;;  %v1531_v2 = vld [vmem:[%s3696_s1 + $0x160] sm:$0xff] }
 0x512   :  { %2627 = vmatmul.msk.f32.gmra.mxu2 %vm643_vm4, %v1209_v3  ;;  %v1532_v3 = vld [vmem:[%s3696_s1 + $0x168] sm:$0xff] }
 0x51a   :  { %2628 = vmatmul.msk.f32.gmra.mxu2 %vm643_vm4, %v1210_v4  ;;  %v1533_v4 = vld [vmem:[%s3696_s1 + $0x170] sm:$0xff] }
 0x522   :  { %2629 = vmatmul.msk.f32.gmra.mxu2 %vm643_vm4, %v1211_v7  ;;  %v1536_v7 = vld [vmem:[%s3696_s1 + $0x188] sm:$0xff] }
 0x52a   :  { %2630 = vmatmul.msk.f32.gmra.mxu2 %vm643_vm4, %v1212_v8  ;;  %v1609_v8 = vld [vmem:[%s3697_s3 + $0x298] sm:$0xff] }
 0x532   :  { %2631 = vmatmul.msk.f32.gmra.mxu2 %vm643_vm4, %v1213_v9  ;;  %v1608_v9 = vld [vmem:[%s3697_s3 + $0x290] sm:$0xff] }
 0x53a   :  { %2632 = vmatmul.msk.f32.gmra.mxu2 %vm643_vm4, %v1214_v19 }
 0x542   :  { %2663 = vmatmul.msk.f32.vlgmr.msrb.gmra.mxu2 %vm737_vm5, %v3124_v14 }
 0x57d   :  { %v1259_v24 = vpop.f32.mrf.mxu2 }
 0x57e   :  { %2634 = vmatmul.msk.f32.vlgmr.msra.gmra.mxu1 %vm737_vm5, %v1259_v24 }
 0x57f   :  { %1485 = vmatpush.msra.mxu1 %v3216_v43 }
 0x581   :  { %1486 = vmatpush.msra.mxu1 %v3222_v44  ;;  %v1492_v44 = vld [vmem:[%s3697_s3 + $0x280] sm:$0xff] }
 0x585   :  { %v1262_v26 = vpop.f32.mrf.mxu2 }
 0x586   :  { %2633 = vmatmul.msk.f32.vlgmr.msra.gmra.mxu0 %vm737_vm5, %v1262_v26 }
 0x587   :  { %1459 = vmatpush.msra.mxu0 %v3198_v36 }
 0x589   :  { %1460 = vmatpush.msra.mxu0 %v3209_v40  ;;  %v2795_v40 = vmov 5  }
 0x58a   :  { %2743 = vset.pattern.permute.xlu2 %v2795_v40 }
 0x58b   :  { %1519 = vperm.xlu2 %2743, %v3101_v30  }
 0x58d   :  { %v1265_v28 = vpop.f32.mrf.mxu2 }
 0x58e   :  { %2635 = vmatmul.msk.f32.vlgmr.msrb.gmra.mxu3 %vm737_vm5, %v1265_v28 }
 0x58f   :  { %1511 = vmatpush.msrb.mxu3 %v1493_v33 }
 0x591   :  { %1512 = vmatpush.msrb.mxu3 %v1492_v44 }
 0x595   :  { %v1268_v31 = vpop.f32.mrf.mxu2 }
 0x596   :  { %2636 = vmatmul.msk.f32.vlgmr.msrb.gmra.mxu0 %vm737_vm5, %v1268_v31  ;;  %v3535_v31 = vld [vmem:[%s3698_s2 + $0x8] sm:$0xff] }
 0x59d   :  { %v1271_v43 = vpop.f32.mrf.mxu2 }
 0x59e   :  { %2637 = vmatmul.msk.f32.vlgmr.msrb.gmra.mxu1 %vm737_vm5, %v1271_v43 }
 0x59f   :  { %1629 = vmatpush.msrb.mxu1 %v3275_v12 }
 0x5a1   :  { %1630 = vmatpush.msrb.mxu1 %v3297_v17 }
 0x5a5   :  { %v1274_v36 = vpop.f32.mrf.mxu2 }
 0x5a6   :  { %2638 = vmatmul.msk.f32.vlgmr.msra.gmra.mxu3 %vm737_vm5, %v1274_v36 }
 0x5a7   :  { %1652 = vmatpush.msra.mxu3 %v1609_v8 }
 0x5a9   :  { %1653 = vmatpush.msra.mxu3 %v1608_v9 }
 0x5ad   :  { %v1277_v35 = vpop.f32.mrf.mxu2 }
 0x5ae   :  { %2639 = vmatmul.msk.f32.vlgmr.msra.gmra.mxu0 %vm737_vm5, %v1277_v35 }
 0x5b5   :  { %v1280_v39 = vpop.f32.mrf.mxu2 }
 0x5b6   :  { %2640 = vmatmul.msk.f32.vlgmr.msra.gmra.mxu1 %vm737_vm5, %v1280_v39 }
 0x5b7   :  { %1677 = vmatpush.msra.mxu1 %v3263_v10 }
 0x5b9   :  { %1678 = vmatpush.msra.mxu1 %v3269_v11 }
 0x5bd   :  { %v1283_v12 = vpop.f32.mrf.mxu2 }
 0x5be   :  { %2641 = vmatmul.msk.f32.vlgmr.msrb.gmra.mxu3 %vm737_vm5, %v1283_v12 }
 0x5bf   :  { %1703 = vmatpush.msrb.mxu3 %v3312_v21 }
 0x5c1   :  { %1704 = vmatpush.msrb.mxu3 %v3318_v23 }
 0x5c5   :  { %v1922_v28 = vpop.f32.mrf.mxu2 }
 0x5e5   :  { %v1520_v11 = vpop.permute.xlu2 %1519 }
 0x5fb   :  { %v1333_v41 = vpop.f32.mrf.mxu1 }
 0x603   :  { %v1310_v17 = vpop.f32.mrf.mxu0 }
 0x604   :  { %v1334_v45 = vadd.f32 %v1333_v41, %v1310_v17 }
 0x611   :  { %v1358_v42 = vpop.f32.mrf.mxu3 }
 0x612   :  { %v1361_v46 = vadd.f32 %v1358_v42, %v1334_v45 }
 0x613   :  { %v1384_v47 = vpop.f32.mrf.mxu0 }
 0x614   :  { %v1387_v49 = vadd.f32 %v1384_v47, %v1361_v46 }
 0x61b   :  { %v1410_v48 = vpop.f32.mrf.mxu1 }
 0x61c   :  { %v1413_v51 = vadd.f32 %v1410_v48, %v1387_v49 }
 0x629   :  { %v1436_v50 = vpop.f32.mrf.mxu3 }
 0x62a   :  { %v1439_v52 = vadd.f32 %v1436_v50, %v1413_v51 }
 0x62b   :  { %v1462_v53 = vpop.f32.mrf.mxu0 }
 0x62c   :  { %v1465_v55 = vadd.f32 %v1462_v53, %v1439_v52  ;;  %v1846_v52 = vld [vmem:[%s3696_s1 + $0x190] sm:$0xff] }
 0x633   :  { %v1488_v54 = vpop.f32.mrf.mxu1 }
 0x634   :  { %v1491_v10 = vadd.f32 %v1488_v54, %v1465_v55  ;;  %v1876_v54 = vpop.permute.xlu1 %1875 }
 0x641   :  { %v1514_v56 = vpop.f32.mrf.mxu3 }
 0x642   :  { %v1517_v57 = vadd.f32 %v1514_v56, %v1491_v10  ;;  %v1981_v56 = vpop.permute.xlu1 %1980 }
 0x644   :  { %v1522_v58 = vadd.f32 %v1520_v11, %v1517_v57 }
 0x646   :  { %v1524_v59 = vmul.f32 1.442695, %v1522_v58  ;;  %vm1523_vm7 = vcmp.gt.f32.partialorder %v1522_v58, 0.0 }
 0x648   :  { %2768 = vpow2.f32 %v1524_v59 }
 0x64e   :  { %v2769_v60 = vpop.eup %2768 }
 0x64f   :  { %v2642_v61 = vadd.f32 -1.0, %v2769_v60 }
 0x651   :  { %v1527_v63 = vsel %vm1523_vm7, %v1522_v58, %v2642_v61  ;;  %v2001_v58 = vpop.permute.xlu1 %2000 }
 0x652   :  { %1579 = vmatpush.msrb.mxu0 %v1527_v63 }
 0x653   :  { %2643 = vmatmul.msk.f32.vlgmr.msrb.gmra.mxu0 %vm643_vm4, %v1528_v62 }
 0x65b   :  { %2644 = vmatmul.msk.f32.gmra.mxu0 %vm643_vm4, %v1529_v0 }
 0x663   :  { %2645 = vmatmul.msk.f32.gmra.mxu0 %vm643_vm4, %v1530_v1 }
 0x66b   :  { %2646 = vmatmul.msk.f32.gmra.mxu0 %vm643_vm4, %v1531_v2  ;;  %v1966_v2 = vpop.permute.xlu1 %1965 }
 0x673   :  { %2647 = vmatmul.msk.f32.gmra.mxu0 %vm643_vm4, %v1532_v3 }
 0x67b   :  { %2648 = vmatmul.msk.f32.gmra.mxu0 %vm643_vm4, %v1533_v4 }
 0x683   :  { %2649 = vmatmul.msk.f32.gmra.mxu0 %vm643_vm4, %v1534_v5  ;;  %v1955_v5 = vld [vmem:[#allocation2] sm:$0xff] }
 0x684   :  { %v1983_v8 = vmul.f32 %v1966_v2, %v1955_v5  ;;  %v2360_v5 = vld [vmem:[%s3697_s3 + $0x340] sm:$0xff] }
 0x68b   :  { %2650 = vmatmul.msk.f32.gmra.mxu0 %vm643_vm4, %v1535_v6 }
 0x693   :  { %2651 = vmatmul.msk.f32.gmra.mxu0 %vm643_vm4, %v1536_v7 }
 0x6d0   :  { %v1581_v19 = vpop.f32.mrf.mxu0 }
 0x6d1   :  { %2653 = vmatmul.msk.f32.vlgmr.msra.gmra.mxu3 %vm737_vm5, %v1581_v19  ;;  %v1989_v19 = vpop.permute.xlu1 %1988 }
 0x6d2   :  { %1755 = vmatpush.msra.mxu3 %v3326_v25  ;;  %v1848_v25 = vld [vmem:[%s3697_s3 + $0x370] sm:$0xff] }
 0x6d4   :  { %1756 = vmatpush.msra.mxu3 %v3332_v27 }
 0x6d8   :  { %v1584_v20 = vpop.f32.mrf.mxu0 }
 0x6d9   :  { %2652 = vmatmul.msk.f32.vlgmr.msrb.gmra.mxu1 %vm737_vm5, %v1584_v20 }
 0x6da   :  { %1729 = vmatpush.msrb.mxu1 %v3281_v13  ;;  %v1815_v13 = vld [vmem:[%s3697_s3 + $0x318] sm:$0xff] }
 0x6dc   :  { %1730 = vmatpush.msrb.mxu1 %v3286_v15  ;;  %v1814_v15 = vld [vmem:[%s3697_s3 + $0x310] sm:$0xff] }
 0x6e0   :  { %v1587_v22 = vpop.f32.mrf.mxu0 }
 0x6e1   :  { %2654 = vmatmul.msk.f32.vlgmr.msra.gmra.mxu1 %vm737_vm5, %v1587_v22  ;;  %v2003_v22 = vadd.f32 %v1989_v19, %v1983_v8  ;;  %v2786_v8 = vld [vmem:[%s3698_s2] sm:$0xff]  ;;  %v2799_v19 = vmov 12  }
 0x6e2   :  { %1781 = vmatpush.msra.mxu1 %v3292_v16  ;;  %v2796_v16 = vmov 8  }
 0x6e3   :  { %2744 = vset.pattern.permute.xlu2 %v2796_v16  ;;  %v2011_v16 = vmul.f32 1.442695, %v2003_v22  ;;  %vm2007_vm11 = vcmp.gt.f32.partialorder %v2003_v22, 0.0 }
 0x6e4   :  { %1782 = vmatpush.msra.mxu1 %v3305_v18  ;;  %v3516_v18 = vld [vmem:[%s3698_s2 + $0x10] sm:$0xff]  ;;  %1928 = vperm.xlu2 %2744, %v3101_v30  }
 0x6e5   :  { %1996 = vperm.xlu0 %2751, %v3516_v18  }
 0x6e8   :  { %v1590_v21 = vpop.f32.mrf.mxu0 }
 0x6e9   :  { %2655 = vmatmul.msk.f32.vlgmr.msrb.gmra.mxu3 %vm737_vm5, %v1590_v21 }
 0x6ea   :  { %1807 = vmatpush.msrb.mxu3 %v3347_v34  ;;  %v1847_v34 = vld [vmem:[%s3697_s3 + $0x368] sm:$0xff] }
 0x6ec   :  { %1808 = vmatpush.msrb.mxu3 %v3354_v37  ;;  %v2797_v37 = vmov 6  }
 0x6ed   :  { %2746 = vset.pattern.permute.xlu2 %v2797_v37  ;;  %2756 = vset.pattern.permute.xlu0 %v2799_v19 }
 0x6ee   :  { %1841 = vperm.xlu2 %2746, %v3101_v30   ;;  %2427 = vperm.xlu0 %2756, %v2786_v8  }
 0x6f0   :  { %v1593_v23 = vpop.f32.mrf.mxu0 }
 0x6f1   :  { %2656 = vmatmul.msk.f32.vlgmr.msrb.gmra.mxu1 %vm737_vm5, %v1593_v23 }
 0x6f2   :  { %1833 = vmatpush.msrb.mxu1 %v1815_v13 }
 0x6f4   :  { %1834 = vmatpush.msrb.mxu1 %v1814_v15 }
 0x6f6   :  { %2749 = vset.pattern.permute.xlu2 %v2793_v32  ;;  %v1902_v32 = vld [vmem:[%s3696_s1 + $0x198] sm:$0xff] }
 0x6f7   :  { %1975 = vperm.xlu2 %2749, %v3516_v18  }
 0x6f8   :  { %v1596_v27 = vpop.f32.mrf.mxu0 }
 0x6f9   :  { %2657 = vmatmul.msk.f32.vlgmr.msra.gmra.mxu3 %vm737_vm5, %v1596_v27 }
 0x6fa   :  { %1866 = vmatpush.msra.mxu3 %v1848_v25 }
 0x6fc   :  { %1867 = vmatpush.msra.mxu3 %v1847_v34 }
 0x6ff   :  { %1970 = vperm.xlu2 %2749, %v3535_v31  }
 0x700   :  { %v1599_v24 = vpop.f32.mrf.mxu0 }
 0x701   :  { %2658 = vmatmul.msk.f32.vlgmr.msra.gmra.mxu1 %vm737_vm5, %v1599_v24 }
 0x707   :  { %2753 = vset.pattern.permute.xlu2 %v2794_v38 }
 0x708   :  { %v1602_v26 = vpop.f32.mrf.mxu0  ;;  %1992 = vperm.xlu2 %2753, %v3535_v31  }
 0x709   :  { %2659 = vmatmul.msk.f32.vlgmr.msrb.gmra.mxu3 %vm737_vm5, %v1602_v26 }
 0x70a   :  { %1949 = vmatpush.msrb.mxu3 %v1922_v28 }
 0x710   :  { %v1605_v30 = vpop.f32.mrf.mxu0 }
 0x711   :  { %2661 = vmatmul.msk.f32.vlgmr.msra.gmra.mxu3 %vm737_vm5, %v3124_v14  ;;  %2660 = vmatmul.msk.f32.vlgmr.msrb.gmra.mxu1 %vm737_vm5, %v1605_v30 }
 0x719   :  { %2664 = vmatmul.msk.f32.vlgmr.msrb.gmra.mxu3 %vm643_vm4, %v1902_v32 }
 0x73e   :  { %v1929_v41 = vpop.permute.xlu2 %1928 }
 0x748   :  { %v1842_v50 = vpop.permute.xlu2 %1841 }
 0x751   :  { %v1976_v0 = vpop.permute.xlu2 %1975 }
 0x754   :  { %v1655_v43 = vpop.f32.mrf.mxu3 }
 0x756   :  { %v1632_v33 = vpop.f32.mrf.mxu1 }
 0x757   :  { %v1656_v40 = vadd.f32 %v1655_v43, %v1632_v33  ;;  %v1997_v21 = vpop.permute.xlu0 %1996  ;;  %v2027_v43 = vld [vmem:[%s3696_s1 + $0x1a0] sm:$0xff] }
 0x759   :  { %v1971_v1 = vpop.permute.xlu2 %1970 }
 0x75e   :  { %v1680_v44 = vpop.f32.mrf.mxu1 }
 0x75f   :  { %v1683_v39 = vadd.f32 %v1680_v44, %v1656_v40  ;;  %v2029_v40 = vld [vmem:[%s3696_s1 + $0x1b0] sm:$0xff] }
 0x762   :  { %v1993_v9 = vpop.permute.xlu2 %1992 }
 0x76c   :  { %v1706_v36 = vpop.f32.mrf.mxu3 }
 0x76d   :  { %v1709_v14 = vadd.f32 %v1706_v36, %v1683_v39  ;;  %v2028_v36 = vld [vmem:[%s3696_s1 + $0x1a8] sm:$0xff]  ;;  %v2031_v39 = vld [vmem:[%s3696_s1 + $0x1c0] sm:$0xff] }
 0x76e   :  { %v1732_v35 = vpop.f32.mrf.mxu1 }
 0x76f   :  { %v1735_v17 = vadd.f32 %v1732_v35, %v1709_v14  ;;  %v2030_v35 = vld [vmem:[%s3696_s1 + $0x1b8] sm:$0xff]  ;;  %v2032_v14 = vld [vmem:[%s3696_s1 + $0x1c8] sm:$0xff] }
 0x77c   :  { %v1758_v12 = vpop.f32.mrf.mxu3 }
 0x77d   :  { %v1761_v42 = vadd.f32 %v1758_v12, %v1735_v17  ;;  %v2033_v12 = vld [vmem:[%s3696_s1 + $0x1d0] sm:$0xff]  ;;  %v2034_v17 = vld [vmem:[%s3696_s1 + $0x1d8] sm:$0xff] }
 0x77e   :  { %v1784_v38 = vpop.f32.mrf.mxu1 }
 0x77f   :  { %v1787_v45 = vadd.f32 %v1784_v38, %v1761_v42  ;;  %v2036_v38 = vld [vmem:[%s3696_s1 + $0x1e8] sm:$0xff]  ;;  %v2037_v42 = vld [vmem:[%s3696_s1 + $0x1f0] sm:$0xff] }
 0x78c   :  { %v1810_v46 = vpop.f32.mrf.mxu3 }
 0x78d   :  { %v1813_v47 = vadd.f32 %v1810_v46, %v1787_v45  ;;  %v2038_v45 = vld [vmem:[%s3696_s1 + $0x1f8] sm:$0xff]  ;;  %v2039_v46 = vld [vmem:[%s3696_s1 + $0x200] sm:$0xff] }
 0x78e   :  { %v1836_v48 = vpop.f32.mrf.mxu1 }
 0x78f   :  { %v1839_v49 = vadd.f32 %v1836_v48, %v1813_v47  ;;  %v2184_v47 = vld [vmem:[%s3697_s3 + $0x320] sm:$0xff]  ;;  %v2040_v48 = vld [vmem:[%s3696_s1 + $0x208] sm:$0xff] }
 0x790   :  { %2254 = vmatpush.msra.mxu3 %v2184_v47 }
 0x791   :  { %v1844_v51 = vadd.f32 %v1842_v50, %v1839_v49  ;;  %v2045_v49 = vld [vmem:[%s3696_s1 + $0x230] sm:$0xff] }
 0x792   :  { %v2041_v50 = vld [vmem:[%s3696_s1 + $0x210] sm:$0xff]  ;;  %2388 = vmatpush.msrb.mxu3 %v2360_v5 }
 0x793   :  { %1845 = vst.msk [vmem:[#allocation2 + $0x8] sm:$0xff] %vm643_vm4, %v1844_v51  ;;  %v2046_v51 = vld [vmem:[%s3696_s1 + $0x238] sm:$0xff] }
 0x794   :  { %v1869_v53 = vpop.f32.mrf.mxu3 }
 0x795   :  { %1896 = vmatpush.msra.mxu1 %v1869_v53 }
 0x796   :  { %2662 = vmatmul.msk.f32.vlgmr.msra.gmra.mxu1 %vm643_vm4, %v1846_v52  ;;  %v2042_v52 = vld [vmem:[%s3696_s1 + $0x218] sm:$0xff] }
 0x79a   :  { %v1956_v3 = vld [vmem:[#allocation2 + $0x8] sm:$0xff] }
 0x79b   :  { %v1984_v7 = vmul.f32 %v1971_v1, %v1956_v3 }
 0x79c   :  { %v1951_v55 = vpop.f32.mrf.mxu3 }
 0x79d   :  { %v1952_v10 = vadd.f32 %v1951_v55, %v1929_v41  ;;  %v2004_v20 = vadd.f32 %v1993_v9, %v1984_v7  ;;  %v2035_v41 = vld [vmem:[%s3696_s1 + $0x1e0] sm:$0xff]  ;;  %v2185_v55 = vld [vmem:[%s3697_s3 + $0x328] sm:$0xff]  ;;  %v2798_v7 = vmov 13  }
 0x79e   :  { %2757 = vset.pattern.permute.xlu1 %v2798_v7 }
 0x79f   :  { %1954 = vst.msk [vmem:[#allocation2 + $0x18] sm:$0xff] %vm643_vm4, %v1952_v10  ;;  %v2013_v23 = vmul.f32 1.442695, %v2004_v20  ;;  %vm2008_vm10 = vcmp.gt.f32.partialorder %v2004_v20, 0.0  ;;  %2447 = vperm.xlu1 %2757, %v2786_v8  }
 0x7a6   :  { %v1958_v11 = vld [vmem:[#allocation2 + $0x18] sm:$0xff] }
 0x7a7   :  { %v1986_v57 = vmul.f32 %v1981_v56, %v1958_v11  ;;  %v2044_v56 = vld [vmem:[%s3696_s1 + $0x228] sm:$0xff]  ;;  %2758 = vset.pattern.permute.xlu1 %v2799_v19 }
 0x7a8   :  { %2431 = vperm.xlu1 %2758, %v3535_v31  }
 0x7a9   :  { %v2006_v59 = vadd.f32 %v2001_v58, %v1986_v57 }
 0x7ab   :  { %v2017_v60 = vmul.f32 1.442695, %v2006_v59  ;;  %vm2010_vm8 = vcmp.gt.f32.partialorder %v2006_v59, 0.0 }
 0x7ad   :  { %2770 = vpow2.f32 %v2017_v60 }
 0x7ae   :  { %2772 = vpow2.f32 %v2013_v23 }
 0x7af   :  { %2774 = vpow2.f32 %v2011_v16 }
 0x7b0   :  { %2435 = vperm.xlu1 %2758, %v3516_v18  }
 0x7b3   :  { %v2771_v61 = vpop.eup %2770 }
 0x7b4   :  { %v2668_v62 = vadd.f32 -1.0, %v2771_v61  ;;  %v2773_v34 = vpop.eup %2772 }
 0x7b5   :  { %v2775_v37 = vpop.eup %2774  ;;  %v2666_v28 = vadd.f32 -1.0, %v2773_v34 }
 0x7b6   :  { %v2026_v63 = vsel %vm2010_vm8, %v2006_v59, %v2668_v62  ;;  %v2665_v32 = vadd.f32 -1.0, %v2775_v37  ;;  %v2268_v59 = vld [vmem:[%s3697_s3 + $0x330] sm:$0xff] }
 0x7b7   :  { %2119 = vmatpush.msrb.mxu1 %v2026_v63  ;;  %2721 = vmatpush.msra.mxu2 %v2026_v63  ;;  %v2024_v33 = vsel %vm2008_vm10, %v2004_v20, %v2666_v28 }
 0x7b8   :  { %v2023_v44 = vsel %vm2007_vm11, %v2003_v22, %v2665_v32  ;;  %2296 = vmatpush.msra.mxu0 %v2268_v59  ;;  %v2800_v22 = vmov 11  }
 0x7b9   :  { %2755 = vset.pattern.permute.xlu2 %v2800_v22  ;;  %2760 = vset.pattern.permute.xlu0 %v2800_v22 }
 0x7ba   :  { %2407 = vperm.xlu2 %2755, %v2786_v8   ;;  %2415 = vperm.xlu0 %2760, %v3516_v18  }
 0x7bb   :  { %2761 = vset.pattern.permute.xlu1 %v2800_v22 }
 0x7bc   :  { %2419 = vperm.xlu1 %2761, %v3338_v29  }
 0x7c2   :  { %2411 = vperm.xlu2 %2755, %v3535_v31   ;;  %2763 = vset.pattern.permute.xlu0 %v2798_v7 }
 0x7c3   :  { %2459 = vperm.xlu0 %2763, %v3338_v29  }
 0x7ca   :  { %2759 = vset.pattern.permute.xlu2 %v2798_v7 }
 0x7cb   :  { %2451 = vperm.xlu2 %2759, %v3535_v31   ;;  %v2487_v31 = vld [vmem:[%s3697_s3 + $0x388] sm:$0xff] }
 0x7cc   :  { %2515 = vmatpush.msrb.mxu0 %v2487_v31 }
 0x7d3   :  { %2455 = vperm.xlu2 %2759, %v3516_v18  }
 0x7db   :  { %2762 = vset.pattern.permute.xlu2 %v2799_v19 }
 0x7dc   :  { %2439 = vperm.xlu2 %2762, %v3338_v29  }
 0x813   :  { %v1898_v4 = vpop.f32.mrf.mxu1 }
 0x814   :  { %v1899_v6 = vadd.f32 %v1898_v4, %v1876_v54  ;;  %v2043_v54 = vld [vmem:[%s3696_s1 + $0x220] sm:$0xff] }
 0x816   :  { %1901 = vst.msk [vmem:[#allocation2 + $0x10] sm:$0xff] %vm643_vm4, %v1899_v6 }
 0x81d   :  { %v1957_v13 = vld [vmem:[#allocation2 + $0x10] sm:$0xff] }
 0x81e   :  { %v1985_v15 = vmul.f32 %v1976_v0, %v1957_v13  ;;  %v2314_v0 = vld [vmem:[%s3697_s3 + $0x338] sm:$0xff] }
 0x820   :  { %v2005_v25 = vadd.f32 %v1997_v21, %v1985_v15 }
 0x822   :  { %v2015_v27 = vmul.f32 1.442695, %v2005_v25  ;;  %vm2009_vm9 = vcmp.gt.f32.partialorder %v2005_v25, 0.0 }
 0x824   :  { %2776 = vpow2.f32 %v2015_v27 }
 0x82a   :  { %v2777_v24 = vpop.eup %2776 }
 0x82b   :  { %v2667_v26 = vadd.f32 -1.0, %v2777_v24 }
 0x82d   :  { %v2025_v30 = vsel %vm2009_vm9, %v2005_v25, %v2667_v26 }
 0x82e   :  { %2120 = vmatpush.msrb.mxu1 %v2025_v30  ;;  %2722 = vmatpush.msra.mxu2 %v2025_v30  ;;  %v2408_v30 = vpop.permute.xlu2 %2407 }
 0x830   :  { %2121 = vmatpush.msrb.mxu1 %v2024_v33  ;;  %2723 = vmatpush.msra.mxu2 %v2024_v33 }
 0x832   :  { %2122 = vmatpush.msrb.mxu1 %v2023_v44  ;;  %2724 = vmatpush.msra.mxu2 %v2023_v44 }
 0x833   :  { %2669 = vmatmul.msk.f32.vlgmr.msrb.gmra.mxu1 %vm160_vm2, %v2027_v43  ;;  %2687 = vmatmul.msk.f32.vlgmr.msra.gmra.mxu2 %vm160_vm2, %v2045_v49  ;;  %v2448_v43 = vpop.permute.xlu1 %2447 }
 0x834   :  { %2213 = vmatpush.msrb.mxu2 %v2185_v55 }
 0x836   :  { %2342 = vmatpush.msra.mxu2 %v2314_v0 }
 0x83b   :  { %2670 = vmatmul.msk.f32.gmra.mxu1 %vm160_vm2, %v2028_v36  ;;  %2688 = vmatmul.msk.f32.gmra.mxu2 %vm160_vm2, %v2046_v51  ;;  %v2412_v36 = vpop.permute.xlu2 %2411 }
 0x843   :  { %2671 = vmatmul.msk.f32.gmra.mxu1 %vm160_vm2, %v2029_v40 }
 0x84b   :  { %2672 = vmatmul.msk.f32.gmra.mxu1 %vm160_vm2, %v2030_v35 }
 0x853   :  { %2673 = vmatmul.msk.f32.gmra.mxu1 %vm160_vm2, %v2031_v39 }
 0x85b   :  { %2674 = vmatmul.msk.f32.gmra.mxu1 %vm160_vm2, %v2032_v14 }
 0x863   :  { %2675 = vmatmul.msk.f32.gmra.mxu1 %vm160_vm2, %v2033_v12  ;;  %v2428_v12 = vpop.permute.xlu0 %2427 }
 0x86b   :  { %2676 = vmatmul.msk.f32.gmra.mxu1 %vm160_vm2, %v2034_v17 }
 0x873   :  { %2677 = vmatmul.msk.f32.gmra.mxu1 %vm160_vm2, %v2035_v41 }
 0x87b   :  { %2678 = vmatmul.msk.f32.gmra.mxu1 %vm160_vm2, %v2036_v38 }
 0x883   :  { %2679 = vmatmul.msk.f32.gmra.mxu1 %vm160_vm2, %v2037_v42 }
 0x88b   :  { %2680 = vmatmul.msk.f32.gmra.mxu1 %vm160_vm2, %v2038_v45  ;;  %v2432_v45 = vpop.permute.xlu1 %2431 }
 0x893   :  { %2681 = vmatmul.msk.f32.gmra.mxu1 %vm160_vm2, %v2039_v46 }
 0x89b   :  { %2682 = vmatmul.msk.f32.gmra.mxu1 %vm160_vm2, %v2040_v48 }
 0x8a3   :  { %2683 = vmatmul.msk.f32.gmra.mxu1 %vm160_vm2, %v2041_v50  ;;  %v2452_v50 = vpop.permute.xlu2 %2451 }
 0x8ab   :  { %2684 = vmatmul.msk.f32.gmra.mxu1 %vm160_vm2, %v2042_v52 }
 0x8b0   :  { %v2124_v53 = vpop.f32.mrf.mxu1 }
 0x8b1   :  { %2693 = vmatmul.msk.f32.vlgmr.msra.gmra.mxu3 %vm643_vm4, %v2124_v53 }
 0x8b3   :  { %2685 = vmatmul.msk.f32.gmra.mxu1 %vm160_vm2, %v2043_v54 }
 0x8b6   :  { %v2178_v23 = vpop.f32.mrf.mxu2 }
 0x8b8   :  { %v2127_v10 = vpop.f32.mrf.mxu1 }
 0x8b9   :  { %2694 = vmatmul.msk.f32.gmra.mxu3 %vm643_vm4, %v2127_v10 }
 0x8bb   :  { %2686 = vmatmul.msk.f32.gmra.mxu1 %vm160_vm2, %v2044_v56 }
 0x8be   :  { %v2181_v15 = vpop.f32.mrf.mxu2 }
 0x8c0   :  { %v2130_v11 = vpop.f32.mrf.mxu1 }
 0x8c1   :  { %2695 = vmatmul.msk.f32.gmra.mxu3 %vm643_vm4, %v2130_v11 }
 0x8c8   :  { %v2133_v57 = vpop.f32.mrf.mxu1 }
 0x8c9   :  { %2696 = vmatmul.msk.f32.gmra.mxu3 %vm643_vm4, %v2133_v57 }
 0x8d0   :  { %v2136_v58 = vpop.f32.mrf.mxu1 }
 0x8d1   :  { %2689 = vmatmul.msk.f32.vlgmr.msrb.gmra.mxu2 %vm643_vm4, %v2136_v58  ;;  %v2436_v58 = vpop.permute.xlu1 %2435 }
 0x8d8   :  { %v2139_v60 = vpop.f32.mrf.mxu1 }
 0x8d9   :  { %2690 = vmatmul.msk.f32.gmra.mxu2 %vm643_vm4, %v2139_v60  ;;  %v2416_v60 = vpop.permute.xlu0 %2415  ;;  %v2420_v22 = vpop.permute.xlu1 %2419 }
 0x8e0   :  { %v2142_v61 = vpop.f32.mrf.mxu1 }
 0x8e1   :  { %2691 = vmatmul.msk.f32.gmra.mxu2 %vm643_vm4, %v2142_v61 }
 0x8e8   :  { %v2145_v62 = vpop.f32.mrf.mxu1 }
 0x8e9   :  { %2692 = vmatmul.msk.f32.gmra.mxu2 %vm643_vm4, %v2145_v62 }
 0x8f0   :  { %v2148_v63 = vpop.f32.mrf.mxu1 }
 0x8f1   :  { %2697 = vmatmul.msk.f32.vlgmr.msra.gmra.mxu0 %vm643_vm4, %v2148_v63 }
 0x8f8   :  { %v2151_v1 = vpop.f32.mrf.mxu1 }
 0x8f9   :  { %2698 = vmatmul.msk.f32.gmra.mxu0 %vm643_vm4, %v2151_v1 }
 0x900   :  { %v2154_v2 = vpop.f32.mrf.mxu1 }
 0x901   :  { %2699 = vmatmul.msk.f32.gmra.mxu0 %vm643_vm4, %v2154_v2  ;;  %v2456_v2 = vpop.permute.xlu2 %2455 }
 0x908   :  { %v2157_v3 = vpop.f32.mrf.mxu1 }
 0x909   :  { %2700 = vmatmul.msk.f32.gmra.mxu0 %vm643_vm4, %v2157_v3 }
 0x910   :  { %v2160_v4 = vpop.f32.mrf.mxu1 }
 0x911   :  { %2701 = vmatmul.msk.f32.vlgmr.msra.gmra.mxu2 %vm643_vm4, %v2160_v4 }
 0x918   :  { %v2163_v6 = vpop.f32.mrf.mxu1 }
 0x919   :  { %2702 = vmatmul.msk.f32.gmra.mxu2 %vm643_vm4, %v2163_v6 }
 0x920   :  { %v2166_v9 = vpop.f32.mrf.mxu1 }
 0x921   :  { %2703 = vmatmul.msk.f32.gmra.mxu2 %vm643_vm4, %v2166_v9 }
 0x928   :  { %v2169_v20 = vpop.f32.mrf.mxu1 }
 0x929   :  { %2704 = vmatmul.msk.f32.gmra.mxu2 %vm643_vm4, %v2169_v20 }
 0x930   :  { %v2172_v21 = vpop.f32.mrf.mxu1 }
 0x931   :  { %2705 = vmatmul.msk.f32.vlgmr.msrb.gmra.mxu3 %vm643_vm4, %v2172_v21 }
 0x934   :  { %v2256_v27 = vpop.f32.mrf.mxu3 }
 0x938   :  { %v2175_v13 = vpop.f32.mrf.mxu1 }
 0x939   :  { %2706 = vmatmul.msk.f32.gmra.mxu3 %vm643_vm4, %v2175_v13 }
 0x93c   :  { %v2259_v37 = vpop.f32.mrf.mxu3 }
 0x941   :  { %2707 = vmatmul.msk.f32.gmra.mxu3 %vm643_vm4, %v2178_v23 }
 0x944   :  { %v2262_v26 = vpop.f32.mrf.mxu3 }
 0x949   :  { %2708 = vmatmul.msk.f32.gmra.mxu3 %vm643_vm4, %v2181_v15 }
 0x94c   :  { %v2265_v32 = vpop.f32.mrf.mxu3 }
 0x954   :  { %v2215_v16 = vpop.f32.mrf.mxu2 }
 0x955   :  { %v2257_v33 = vadd.f32 %v2256_v27, %v2215_v16  ;;  %v2440_v16 = vpop.permute.xlu2 %2439 }
 0x95c   :  { %v2218_v25 = vpop.f32.mrf.mxu2 }
 0x95d   :  { %v2260_v17 = vadd.f32 %v2259_v37, %v2218_v25 }
 0x964   :  { %v2221_v34 = vpop.f32.mrf.mxu2 }
 0x965   :  { %v2263_v54 = vadd.f32 %v2262_v26, %v2221_v34  ;;  %v2460_v34 = vpop.permute.xlu0 %2459 }
 0x96c   :  { %v2224_v24 = vpop.f32.mrf.mxu2 }
 0x96d   :  { %v2266_v3 = vadd.f32 %v2265_v32, %v2224_v24 }
 0x96e   :  { %v2298_v28 = vpop.f32.mrf.mxu0 }
 0x96f   :  { %v2310_v44 = vadd.f32 %v2298_v28, %v2257_v33 }
 0x976   :  { %v2301_v29 = vpop.f32.mrf.mxu0 }
 0x977   :  { %v2311_v38 = vadd.f32 %v2301_v29, %v2260_v17 }
 0x97e   :  { %v2304_v47 = vpop.f32.mrf.mxu0 }
 0x97f   :  { %v2312_v10 = vadd.f32 %v2304_v47, %v2263_v54 }
 0x986   :  { %v2307_v0 = vpop.f32.mrf.mxu0 }
 0x987   :  { %v2313_v7 = vadd.f32 %v2307_v0, %v2266_v3 }
 0x994   :  { %v2344_v18 = vpop.f32.mrf.mxu2 }
 0x995   :  { %v2356_v40 = vadd.f32 %v2344_v18, %v2310_v44 }
 0x99c   :  { %v2347_v35 = vpop.f32.mrf.mxu2 }
 0x99d   :  { %v2357_v46 = vadd.f32 %v2347_v35, %v2311_v38 }
 0x9a4   :  { %v2350_v53 = vpop.f32.mrf.mxu2 }
 0x9a5   :  { %v2358_v11 = vadd.f32 %v2350_v53, %v2312_v10 }
 0x9ac   :  { %v2353_v5 = vpop.f32.mrf.mxu2 }
 0x9ad   :  { %v2359_v9 = vadd.f32 %v2353_v5, %v2313_v7 }
 0x9b4   :  { %v2390_v39 = vpop.f32.mrf.mxu3 }
 0x9b5   :  { %v2402_v14 = vadd.f32 %v2390_v39, %v2356_v40  ;;  %v2486_v40 = vld [vmem:[%s3696_s1 + $0x240] sm:$0xf] }
 0x9b7   :  { %v2422_v41 = vadd.f32 %v2408_v30, %v2402_v14 }
 0x9b9   :  { %v2442_v42 = vmul.f32 %v2428_v12, %v2422_v41 }
 0x9bb   :  { %v2462_v48 = vadd.f32 %v2448_v43, %v2442_v42 }
 0x9bc   :  { %v2393_v49 = vpop.f32.mrf.mxu3 }
 0x9bd   :  { %v2470_v51 = vmul.f32 1.442695, %v2462_v48  ;;  %v2403_v52 = vadd.f32 %v2393_v49, %v2357_v46  ;;  %vm2466_vm12 = vcmp.gt.f32.partialorder %v2462_v48, 0.0 }
 0x9bf   :  { %2778 = vpow2.f32 %v2470_v51  ;;  %v2423_v55 = vadd.f32 %v2412_v36, %v2403_v52 }
 0x9c1   :  { %v2443_v56 = vmul.f32 %v2432_v45, %v2423_v55 }
 0x9c3   :  { %v2463_v57 = vadd.f32 %v2452_v50, %v2443_v56 }
 0x9c4   :  { %v2396_v59 = vpop.f32.mrf.mxu3 }
 0x9c5   :  { %v2779_v61 = vpop.eup %2778  ;;  %v2472_v62 = vmul.f32 1.442695, %v2463_v57  ;;  %v2404_v63 = vadd.f32 %v2396_v59, %v2358_v11  ;;  %vm2467_vm13 = vcmp.gt.f32.partialorder %v2463_v57, 0.0 }
 0x9c6   :  { %v2709_v1 = vadd.f32 -1.0, %v2779_v61 }
 0x9c7   :  { %2780 = vpow2.f32 %v2472_v62  ;;  %v2424_v4 = vadd.f32 %v2416_v60, %v2404_v63 }
 0x9c8   :  { %v2482_v6 = vsel %vm2466_vm12, %v2462_v48, %v2709_v1 }
 0x9c9   :  { %v2444_v8 = vmul.f32 %v2436_v58, %v2424_v4  ;;  %2713 = vmatmul.msk.f32.vlgmr.msrb.gmra.mxu0 %vm643_vm4, %v2482_v6 }
 0x9cb   :  { %v2464_v19 = vadd.f32 %v2456_v2, %v2444_v8 }
 0x9cc   :  { %v2399_v20 = vpop.f32.mrf.mxu3 }
 0x9cd   :  { %v2781_v21 = vpop.eup %2780  ;;  %v2474_v13 = vmul.f32 1.442695, %v2464_v19  ;;  %v2405_v23 = vadd.f32 %v2399_v20, %v2359_v9  ;;  %vm2468_vm14 = vcmp.gt.f32.partialorder %v2464_v19, 0.0 }
 0x9ce   :  { %v2710_v15 = vadd.f32 -1.0, %v2781_v21 }
 0x9cf   :  { %2782 = vpow2.f32 %v2474_v13  ;;  %v2425_v25 = vadd.f32 %v2420_v22, %v2405_v23 }
 0x9d0   :  { %v2483_v27 = vsel %vm2467_vm13, %v2463_v57, %v2710_v15 }
 0x9d1   :  { %v2445_v37 = vmul.f32 %v2440_v16, %v2425_v25  ;;  %2714 = vmatmul.msk.f32.gmra.mxu0 %vm643_vm4, %v2483_v27 }
 0x9d3   :  { %v2465_v24 = vadd.f32 %v2460_v34, %v2445_v37 }
 0x9d5   :  { %v2783_v26 = vpop.eup %2782  ;;  %v2476_v28 = vmul.f32 1.442695, %v2465_v24  ;;  %vm2469_vm15 = vcmp.gt.f32.partialorder %v2465_v24, 0.0 }
 0x9d6   :  { %v2711_v30 = vadd.f32 -1.0, %v2783_v26 }
 0x9d7   :  { %2784 = vpow2.f32 %v2476_v28 }
 0x9d8   :  { %v2484_v31 = vsel %vm2468_vm14, %v2464_v19, %v2711_v30 }
 0x9d9   :  { %2715 = vmatmul.msk.f32.gmra.mxu0 %vm643_vm4, %v2484_v31 }
 0x9dd   :  { %v2785_v18 = vpop.eup %2784 }
 0x9de   :  { %v2712_v32 = vadd.f32 -1.0, %v2785_v18 }
 0x9e0   :  { %v2485_v33 = vsel %vm2469_vm15, %v2465_v24, %v2712_v32 }
 0x9e1   :  { %2716 = vmatmul.msk.f32.gmra.mxu0 %vm643_vm4, %v2485_v33 }
 0xa46   :  { %v2517_v43 = vpop.f32.mrf.mxu0 }
 0xa4e   :  { %v2520_v44 = vpop.f32.mrf.mxu0 }
 0xa56   :  { %v2523_v29 = vpop.f32.mrf.mxu0 }
 0xa5e   :  { %v2526_v36 = vpop.f32.mrf.mxu0 }
 0xa5f   :  { %2544 = vmatpush.msrb.mxu2 %v2526_v36 }
 0xa61   :  { %2545 = vmatpush.msrb.mxu2 %v2523_v29 }
 0xa63   :  { %2546 = vmatpush.msrb.mxu2 %v2520_v44 }
 0xa65   :  { %2547 = vmatpush.msrb.mxu2 %v2517_v43 }
 0xa66   :  { %2717 = vmatmul.msk.f32.vlgmr.msrb.gmra.mxu2 %vm160_vm2, %v2486_v40 }
 0xae9   :  { %v2549_v35 = vpop.f32.mrf.mxu2 }
 0xaea   :  { %2553 = vst.msk [vmem:[%s3699_s4] sm:$0xf] %vm2552_vm0, %v2549_v35 }

</bundles_post_ra>
